<compile_context>
chip_gen: v7x
topology: tpu7x:2x2x1
jax: 0.10.0
libtpu: 0.0.40
codegen_flags: <defaults>
</compile_context>

<pallas_src>
import functools
import math

import jax
import jax.numpy as jnp
from jax import lax
from jax.experimental import pallas as pl
from jax.experimental.pallas import tpu as pltpu


def _round_up(x, m):
    return ((x + m - 1) // m) * m


def _gat_kernel(xq_ref, xkv_ref, wq_ref, wkv_ref, wo_ref, bo_ref, o_ref,
                q_scr, m_scr, l_scr, acc_scr, *, num_nodes):
    """Grid = (query tiles, kv tiles).  One query tile is resident; kv tiles stream."""
    ki = pl.program_id(1)
    nk = pl.num_programs(1)
    ep = wkv_ref.shape[1] // 2          # padded embed dim (static)
    tq = q_scr.shape[0]
    tk = xkv_ref.shape[0]

    @pl.when(ki == 0)
    def _init():
        # Q projection (1/sqrt(E) already folded into wq) — once per query tile.
        q_scr[...] = jnp.dot(xq_ref[...], wq_ref[...],
                             preferred_element_type=jnp.float32)
        m_scr[...] = jnp.full_like(m_scr, -jnp.inf)
        l_scr[...] = jnp.zeros_like(l_scr)
        acc_scr[...] = jnp.zeros_like(acc_scr)

    # Fused K/V projection: single (TK, Dp) x (Dp, 2*Ep) MXU pass.
    kv = jnp.dot(xkv_ref[...], wkv_ref[...], preferred_element_type=jnp.float32)
    k = kv[:, :ep]
    v = kv[:, ep:]

    # scores = Q K^T : contract last dims of both operands (no explicit transpose).
    s = lax.dot_general(q_scr[...], k, (((1,), (1,)), ((), ())),
                        preferred_element_type=jnp.float32)           # (TQ, TK)

    # Mask padded key rows so they contribute nothing to the softmax.
    key_idx = ki * tk + lax.broadcasted_iota(jnp.int32, (tq, tk), 1)
    s = jnp.where(key_idx < num_nodes, s, -1e30)

    # Online (streaming) softmax update.
    m_prev = m_scr[...]
    m_new = jnp.maximum(m_prev, jnp.max(s, axis=-1, keepdims=True))
    alpha = jnp.exp(m_prev - m_new)
    p = jnp.exp(s - m_new)
    l_scr[...] = alpha * l_scr[...] + jnp.sum(p, axis=-1, keepdims=True)
    acc_scr[...] = alpha * acc_scr[...] + jnp.dot(
        p, v, preferred_element_type=jnp.float32)
    m_scr[...] = m_new

    @pl.when(ki == nk - 1)
    def _finalize():
        # Normalize with approx reciprocal (EUP), project out, add bias once.
        attn = acc_scr[...] * pl.reciprocal(l_scr[...], approx=True)
        out = jnp.dot(attn, wo_ref[...], preferred_element_type=jnp.float32)
        out = out + bo_ref[...]
        o_ref[...] = out.astype(o_ref.dtype)


def gat_layer(x, wq, wk, wv, wo, bo, *, block=128):
    """x: (N, D). wq/wk/wv: (D, E) (pre-transposed). wo: (E, D). bo: (1, D)."""
    n, d = x.shape
    e = wq.shape[1]
    scale = 1.0 / math.sqrt(float(e))   # scale uses the *original* embed dim

    # Lane-dense padding (zeros -> numerically exact for the valid region).
    dp = _round_up(d, 128)
    ep = _round_up(e, 128)
    n_p = _round_up(n, block)

    x_p = jnp.zeros((n_p, dp), x.dtype).at[:n, :d].set(x)
    wq_p = jnp.zeros((dp, ep), wq.dtype).at[:d, :e].set(wq * scale)   # fold scale
    wk_p = jnp.zeros((dp, ep), wk.dtype).at[:d, :e].set(wk)
    wv_p = jnp.zeros((dp, ep), wv.dtype).at[:d, :e].set(wv)
    wkv_p = jnp.concatenate([wk_p, wv_p], axis=1)                     # (Dp, 2*Ep)
    wo_p = jnp.zeros((ep, dp), wo.dtype).at[:e, :d].set(wo)
    bo_p = jnp.zeros((1, dp), bo.dtype).at[:, :d].set(bo.reshape(1, d))

    grid = (n_p // block, n_p // block)

    flops = (2 * n_p * dp * 3 * ep          # QKV projections
             + 4 * n_p * n_p * ep           # QK^T and P@V
             + 2 * n_p * ep * dp)           # output projection
    bytes_accessed = (2 * x_p.size * x_p.dtype.itemsize
                      + (wq_p.size + wkv_p.size + wo_p.size + bo_p.size) * 4
                      + n_p * dp * x_p.dtype.itemsize)

    out_p = pl.pallas_call(
        functools.partial(_gat_kernel, num_nodes=n),
        out_shape=jax.ShapeDtypeStruct((n_p, dp), x.dtype),
        grid=grid,
        in_specs=[
            pl.BlockSpec((block, dp), lambda qi, ki: (qi, 0)),    # x (query rows)
            pl.BlockSpec((block, dp), lambda qi, ki: (ki, 0)),    # x (key/value rows)
            pl.BlockSpec((dp, ep), lambda qi, ki: (0, 0)),        # wq (scaled), resident
            pl.BlockSpec((dp, 2 * ep), lambda qi, ki: (0, 0)),    # fused wk|wv, resident
            pl.BlockSpec((ep, dp), lambda qi, ki: (0, 0)),        # wo, resident
            pl.BlockSpec((1, dp), lambda qi, ki: (0, 0)),         # bias, resident
        ],
        out_specs=pl.BlockSpec((block, dp), lambda qi, ki: (qi, 0)),
        scratch_shapes=[
            pltpu.VMEM((block, ep), jnp.float32),   # Q tile
            pltpu.VMEM((block, 1), jnp.float32),    # running max m
            pltpu.VMEM((block, 1), jnp.float32),    # running denom l
            pltpu.VMEM((block, ep), jnp.float32),   # output accumulator
        ],
        compiler_params=pltpu.CompilerParams(
            # query tiles shard across TensorCores (v7x); KV axis is the reduction.
            dimension_semantics=("parallel", "arbitrary")),
        cost_estimate=pl.CostEstimate(
            flops=flops, transcendentals=n_p * n_p, bytes_accessed=bytes_accessed),
    )(x_p, x_p, wq_p, wkv_p, wo_p, bo_p)

    return out_p[:n, :d]


def _reference(x, wq, wk, wv, wo, bo):
    q = x @ wq
    k = x @ wk
    v = x @ wv
    s = (q @ k.T) / math.sqrt(q.shape[-1])
    s = jax.nn.softmax(s, axis=-1)
    return (s @ v) @ wo + bo


if __name__ == "__main__":
    num_nodes = 16
    input_dim = 8
    embed_dim = 32

    key = jax.random.PRNGKey(0)
    kx, kq, kk, kvk, ko, kb = jax.random.split(key, 6)

    x = jax.random.normal(kx, (num_nodes, input_dim), dtype=jnp.float32)

    # PyTorch nn.Linear weights are (out_features, in_features); stored pre-transposed
    # as (in, out) so the kernel does plain `x @ W`.
    bound_qkv = 1.0 / math.sqrt(input_dim)
    bound_out = 1.0 / math.sqrt(embed_dim)
    wq = jax.random.uniform(kq, (input_dim, embed_dim), jnp.float32, -bound_qkv, bound_qkv)
    wk = jax.random.uniform(kk, (input_dim, embed_dim), jnp.float32, -bound_qkv, bound_qkv)
    wv = jax.random.uniform(kvk, (input_dim, embed_dim), jnp.float32, -bound_qkv, bound_qkv)
    wo = jax.random.uniform(ko, (embed_dim, input_dim), jnp.float32, -bound_out, bound_out)
    bo = jax.random.uniform(kb, (1, input_dim), jnp.float32, -bound_out, bound_out)

    out = gat_layer(x, wq, wk, wv, wo, bo)
    out = jax.block_until_ready(out)

    ref = _reference(x, wq, wk, wv, wo, bo)
    assert out.shape == (num_nodes, input_dim)
    # Tolerance covers the approx (EUP) reciprocal in the softmax normalization.
    assert jnp.allclose(out, ref, atol=1e-2, rtol=1e-2), "mismatch vs reference"

    print("KERNEL_OK")
</pallas_src>

<mosaic_0001>
module attributes {stable_mosaic.version = 11 : i64} {
  func.func @_gat_kernel(%arg0: i32, %arg1: i32, %arg2: memref<128x128xf32, #tpu.memory_space<vmem>>, %arg3: memref<128x128xf32, #tpu.memory_space<vmem>>, %arg4: memref<128x128xf32, #tpu.memory_space<vmem>>, %arg5: memref<128x256xf32, #tpu.memory_space<vmem>>, %arg6: memref<128x128xf32, #tpu.memory_space<vmem>>, %arg7: memref<1x128xf32, #tpu.memory_space<vmem>>, %arg8: memref<128x128xf32, #tpu.memory_space<vmem>>, %arg9: memref<128x128xf32, #tpu.memory_space<vmem>>, %arg10: memref<128x1xf32, #tpu.memory_space<vmem>>, %arg11: memref<128x1xf32, #tpu.memory_space<vmem>>, %arg12: memref<128x128xf32, #tpu.memory_space<vmem>>) attributes {dimension_semantics = [#tpu.dimension_semantics<parallel>, #tpu.dimension_semantics<arbitrary>], iteration_bounds = array<i64: 1, 1>, scalar_prefetch = 0 : i64, scratch_operands = 4 : i64, tpu.core_type = #tpu.core_type<tc>, window_params = [{transform_indices = @transform_0, window_bounds = array<i64: 128, 128>}, {transform_indices = @transform_1, window_bounds = array<i64: 128, 128>}, {pipeline_mode = #tpu.pipeline_mode<synchronous>, transform_indices = @transform_2, window_bounds = array<i64: 128, 128>}, {pipeline_mode = #tpu.pipeline_mode<synchronous>, transform_indices = @transform_3, window_bounds = array<i64: 128, 256>}, {pipeline_mode = #tpu.pipeline_mode<synchronous>, transform_indices = @transform_4, window_bounds = array<i64: 128, 128>}, {pipeline_mode = #tpu.pipeline_mode<synchronous>, transform_indices = @transform_5, window_bounds = array<i64: 1, 128>}, {transform_indices = @transform_6, window_bounds = array<i64: 128, 128>}]} {
    %c0_i32 = arith.constant 0 : i32
    %0 = arith.cmpi eq, %arg1, %c0_i32 : i32
    %1 = arith.extui %0 : i1 to i32
    %c0_i32_0 = arith.constant 0 : i32
    %2 = arith.cmpi ne, %1, %c0_i32_0 : i32
    scf.if %2 {
      %c0_25 = arith.constant 0 : index
      %c0_26 = arith.constant 0 : index
      %43 = vector.load %arg2[%c0_25, %c0_26] : memref<128x128xf32, #tpu.memory_space<vmem>>, vector<128x128xf32>
      %c0_27 = arith.constant 0 : index
      %c0_28 = arith.constant 0 : index
      %44 = vector.load %arg4[%c0_27, %c0_28] : memref<128x128xf32, #tpu.memory_space<vmem>>, vector<128x128xf32>
      %cst_29 = arith.constant dense<0.000000e+00> : vector<128x128xf32>
      %45 = tpu.matmul %43, %44, %cst_29 {dimension_numbers = #tpu.dot_dimension_numbers<[1], [0], [0], [1], [0, 0, 1, 1], [], []>} : vector<128x128xf32>, vector<128x128xf32>, vector<128x128xf32> -> vector<128x128xf32>
      %c0_30 = arith.constant 0 : index
      %c0_31 = arith.constant 0 : index
      %46 = vector.load %arg9[%c0_30, %c0_31] : memref<128x128xf32, #tpu.memory_space<vmem>>, vector<128x128xf32>
      tpu.vector_store %arg9[%c0_30, %c0_31], %45 {strides = array<i32>} : memref<128x128xf32, #tpu.memory_space<vmem>>, vector<128x128xf32>,
      %cst_32 = arith.constant 0xFF800000 : f32
      %47 = vector.broadcast %cst_32 : f32 to vector<128x1xf32>
      %c0_33 = arith.constant 0 : index
      %c0_34 = arith.constant 0 : index
      %48 = vector.load %arg10[%c0_33, %c0_34] : memref<128x1xf32, #tpu.memory_space<vmem>>, vector<128x1xf32>
      tpu.vector_store %arg10[%c0_33, %c0_34], %47 {strides = array<i32>} : memref<128x1xf32, #tpu.memory_space<vmem>>, vector<128x1xf32>,
      %cst_35 = arith.constant 0.000000e+00 : f32
      %49 = vector.broadcast %cst_35 : f32 to vector<128x1xf32>
      %c0_36 = arith.constant 0 : index
      %c0_37 = arith.constant 0 : index
      %50 = vector.load %arg11[%c0_36, %c0_37] : memref<128x1xf32, #tpu.memory_space<vmem>>, vector<128x1xf32>
      tpu.vector_store %arg11[%c0_36, %c0_37], %49 {strides = array<i32>} : memref<128x1xf32, #tpu.memory_space<vmem>>, vector<128x1xf32>,
      %cst_38 = arith.constant 0.000000e+00 : f32
      %51 = vector.broadcast %cst_38 : f32 to vector<128x128xf32>
      %c0_39 = arith.constant 0 : index
      %c0_40 = arith.constant 0 : index
      %52 = vector.load %arg12[%c0_39, %c0_40] : memref<128x128xf32, #tpu.memory_space<vmem>>, vector<128x128xf32>
      tpu.vector_store %arg12[%c0_39, %c0_40], %51 {strides = array<i32>} : memref<128x128xf32, #tpu.memory_space<vmem>>, vector<128x128xf32>,
    } else {
    }
    %c0 = arith.constant 0 : index
    %c0_1 = arith.constant 0 : index
    %3 = vector.load %arg3[%c0, %c0_1] : memref<128x128xf32, #tpu.memory_space<vmem>>, vector<128x128xf32>
    %c0_2 = arith.constant 0 : index
    %c0_3 = arith.constant 0 : index
    %4 = vector.load %arg5[%c0_2, %c0_3] : memref<128x256xf32, #tpu.memory_space<vmem>>, vector<128x256xf32>
    %cst = arith.constant dense<0.000000e+00> : vector<128x256xf32>
    %5 = tpu.matmul %3, %4, %cst {dimension_numbers = #tpu.dot_dimension_numbers<[1], [0], [0], [1], [0, 0, 1, 1], [], []>} : vector<128x128xf32>, vector<128x256xf32>, vector<128x256xf32> -> vector<128x256xf32>
    %6 = vector.extract_strided_slice %5 {offsets = [0, 0], sizes = [128, 128], strides = [1, 1]} : vector<128x256xf32> to vector<128x128xf32>
    %7 = vector.extract_strided_slice %5 {offsets = [0, 128], sizes = [128, 128], strides = [1, 1]} : vector<128x256xf32> to vector<128x128xf32>
    %c0_4 = arith.constant 0 : index
    %c0_5 = arith.constant 0 : index
    %8 = vector.load %arg9[%c0_4, %c0_5] : memref<128x128xf32, #tpu.memory_space<vmem>>, vector<128x128xf32>
    %cst_6 = arith.constant dense<0.000000e+00> : vector<128x128xf32>
    %9 = tpu.matmul %8, %6, %cst_6 {dimension_numbers = #tpu.dot_dimension_numbers<[1], [1], [0], [0], [0, 0, 1, 0], [], []>} : vector<128x128xf32>, vector<128x128xf32>, vector<128x128xf32> -> vector<128x128xf32>
    %c128_i32 = arith.constant 128 : i32
    %10 = arith.muli %arg1, %c128_i32 : i32
    %11 = tpu.iota {dimensions = array<i32: 1>} : vector<128x128xi32>
    %12 = vector.broadcast %10 : i32 to vector<128x128xi32>
    %13 = arith.addi %12, %11 : vector<128x128xi32>
    %c16_i32 = arith.constant 16 : i32
    %14 = vector.broadcast %c16_i32 : i32 to vector<128x128xi32>
    %15 = arith.cmpi slt, %13, %14 : vector<128x128xi32>
    %cst_7 = arith.constant -1.000000e+30 : f32
    %16 = vector.broadcast %cst_7 : f32 to vector<128x128xf32>
    %17 = arith.select %15, %9, %16 : vector<128x128xi1>, vector<128x128xf32>
    %c0_8 = arith.constant 0 : index
    %c0_9 = arith.constant 0 : index
    %18 = vector.load %arg10[%c0_8, %c0_9] : memref<128x1xf32, #tpu.memory_space<vmem>>, vector<128x1xf32>
    %cst_10 = arith.constant dense<0xFF800000> : vector<128xf32>
    %19 = vector.multi_reduction <maximumf>, %17, %cst_10 [1] : vector<128x128xf32> to vector<128xf32>
    %20 = vector.shape_cast %19 : vector<128xf32> to vector<128x1xf32>
    %21 = arith.maximumf %18, %20 : vector<128x1xf32>
    %22 = arith.subf %18, %21 : vector<128x1xf32>
    %23 = math.exp %22 : vector<128x1xf32>
    %24 = vector.broadcast %21 : vector<128x1xf32> to vector<128x128xf32>
    %25 = arith.subf %17, %24 : vector<128x128xf32>
    %26 = math.exp %25 : vector<128x128xf32>
    %c0_11 = arith.constant 0 : index
    %c0_12 = arith.constant 0 : index
    %27 = vector.load %arg11[%c0_11, %c0_12] : memref<128x1xf32, #tpu.memory_space<vmem>>, vector<128x1xf32>
    %28 = arith.mulf %23, %27 : vector<128x1xf32>
    %cst_13 = arith.constant dense<0.000000e+00> : vector<128xf32>
    %29 = vector.multi_reduction <add>, %26, %cst_13 [1] : vector<128x128xf32> to vector<128xf32>
    %30 = vector.shape_cast %29 : vector<128xf32> to vector<128x1xf32>
    %31 = arith.addf %28, %30 : vector<128x1xf32>
    %c0_14 = arith.constant 0 : index
    %c0_15 = arith.constant 0 : index
    %32 = vector.load %arg11[%c0_14, %c0_15] : memref<128x1xf32, #tpu.memory_space<vmem>>, vector<128x1xf32>
    tpu.vector_store %arg11[%c0_14, %c0_15], %31 {strides = array<i32>} : memref<128x1xf32, #tpu.memory_space<vmem>>, vector<128x1xf32>,
    %c0_16 = arith.constant 0 : index
    %c0_17 = arith.constant 0 : index
    %33 = vector.load %arg12[%c0_16, %c0_17] : memref<128x128xf32, #tpu.memory_space<vmem>>, vector<128x128xf32>
    %34 = vector.broadcast %23 : vector<128x1xf32> to vector<128x128xf32>
    %35 = arith.mulf %34, %33 : vector<128x128xf32>
    %cst_18 = arith.constant dense<0.000000e+00> : vector<128x128xf32>
    %36 = tpu.matmul %26, %7, %cst_18 {dimension_numbers = #tpu.dot_dimension_numbers<[1], [0], [0], [1], [0, 0, 1, 1], [], []>} : vector<128x128xf32>, vector<128x128xf32>, vector<128x128xf32> -> vector<128x128xf32>
    %37 = arith.addf %35, %36 : vector<128x128xf32>
    %c0_19 = arith.constant 0 : index
    %c0_20 = arith.constant 0 : index
    %38 = vector.load %arg12[%c0_19, %c0_20] : memref<128x128xf32, #tpu.memory_space<vmem>>, vector<128x128xf32>
    tpu.vector_store %arg12[%c0_19, %c0_20], %37 {strides = array<i32>} : memref<128x128xf32, #tpu.memory_space<vmem>>, vector<128x128xf32>,
    %c0_21 = arith.constant 0 : index
    %c0_22 = arith.constant 0 : index
    %39 = vector.load %arg10[%c0_21, %c0_22] : memref<128x1xf32, #tpu.memory_space<vmem>>, vector<128x1xf32>
    tpu.vector_store %arg10[%c0_21, %c0_22], %21 {strides = array<i32>} : memref<128x1xf32, #tpu.memory_space<vmem>>, vector<128x1xf32>,
    %c0_i32_23 = arith.constant 0 : i32
    %40 = arith.cmpi eq, %arg1, %c0_i32_23 : i32
    %41 = arith.extui %40 : i1 to i32
    %c0_i32_24 = arith.constant 0 : i32
    %42 = arith.cmpi ne, %41, %c0_i32_24 : i32
    scf.if %42 {
      %c0_25 = arith.constant 0 : index
      %c0_26 = arith.constant 0 : index
      %43 = vector.load %arg12[%c0_25, %c0_26] : memref<128x128xf32, #tpu.memory_space<vmem>>, vector<128x128xf32>
      %c0_27 = arith.constant 0 : index
      %c0_28 = arith.constant 0 : index
      %44 = vector.load %arg11[%c0_27, %c0_28] : memref<128x1xf32, #tpu.memory_space<vmem>>, vector<128x1xf32>
      %45 = tpu.reciprocal %44 {approx = true} : vector<128x1xf32> -> vector<128x1xf32>
      %46 = vector.broadcast %45 : vector<128x1xf32> to vector<128x128xf32>
      %47 = arith.mulf %43, %46 : vector<128x128xf32>
      %c0_29 = arith.constant 0 : index
      %c0_30 = arith.constant 0 : index
      %48 = vector.load %arg6[%c0_29, %c0_30] : memref<128x128xf32, #tpu.memory_space<vmem>>, vector<128x128xf32>
      %cst_31 = arith.constant dense<0.000000e+00> : vector<128x128xf32>
      %49 = tpu.matmul %47, %48, %cst_31 {dimension_numbers = #tpu.dot_dimension_numbers<[1], [0], [0], [1], [0, 0, 1, 1], [], []>} : vector<128x128xf32>, vector<128x128xf32>, vector<128x128xf32> -> vector<128x128xf32>
      %c0_32 = arith.constant 0 : index
      %c0_33 = arith.constant 0 : index
      %50 = vector.load %arg7[%c0_32, %c0_33] : memref<1x128xf32, #tpu.memory_space<vmem>>, vector<1x128xf32>
      %51 = vector.broadcast %50 : vector<1x128xf32> to vector<128x128xf32>
      %52 = arith.addf %49, %51 : vector<128x128xf32>
      %c0_34 = arith.constant 0 : index
      %c0_35 = arith.constant 0 : index
      %53 = vector.load %arg8[%c0_34, %c0_35] : memref<128x128xf32, #tpu.memory_space<vmem>>, vector<128x128xf32>
      tpu.vector_store %arg8[%c0_34, %c0_35], %52 {strides = array<i32>} : memref<128x128xf32, #tpu.memory_space<vmem>>, vector<128x128xf32>,
    } else {
    }
    return
  }
  func.func @transform_0(%arg0: i32, %arg1: i32) -> (i32, i32) {
    %c0_i32 = arith.constant 0 : i32
    %c0_i32_0 = arith.constant 0 : i32
    return %arg0, %c0_i32 : i32, i32
  }
  func.func @transform_1(%arg0: i32, %arg1: i32) -> (i32, i32) {
    %c0_i32 = arith.constant 0 : i32
    %c0_i32_0 = arith.constant 0 : i32
    return %arg1, %c0_i32 : i32, i32
  }
  func.func @transform_2(%arg0: i32, %arg1: i32) -> (i32, i32) {
    %c0_i32 = arith.constant 0 : i32
    %c0_i32_0 = arith.constant 0 : i32
    %c0_i32_1 = arith.constant 0 : i32
    return %c0_i32, %c0_i32_0 : i32, i32
  }
  func.func @transform_3(%arg0: i32, %arg1: i32) -> (i32, i32) {
    %c0_i32 = arith.constant 0 : i32
    %c0_i32_0 = arith.constant 0 : i32
    %c0_i32_1 = arith.constant 0 : i32
    return %c0_i32, %c0_i32_0 : i32, i32
  }
  func.func @transform_4(%arg0: i32, %arg1: i32) -> (i32, i32) {
    %c0_i32 = arith.constant 0 : i32
    %c0_i32_0 = arith.constant 0 : i32
    %c0_i32_1 = arith.constant 0 : i32
    return %c0_i32, %c0_i32_0 : i32, i32
  }
  func.func @transform_5(%arg0: i32, %arg1: i32) -> (i32, i32) {
    %c0_i32 = arith.constant 0 : i32
    %c0_i32_0 = arith.constant 0 : i32
    %c0_i32_1 = arith.constant 0 : i32
    return %c0_i32, %c0_i32_0 : i32, i32
  }
  func.func @transform_6(%arg0: i32, %arg1: i32) -> (i32, i32) {
    %c0_i32 = arith.constant 0 : i32
    %c0_i32_0 = arith.constant 0 : i32
    return %arg0, %c0_i32 : i32, i32
  }
}

</mosaic_0001>

<bundles_post_ra>
// kernel: tpu_custom_call.1
= control target key start
LH: loop header
LB: loop body
LE: loop exit
PB: predicated region body
PF: predicated region fallthrough
CT: control target
= control target key end

     0   :  { %11 = vsyncpa [#allocation7], 0  ;;  %s3131_s0 = inlined_call_operand.hbm [shape: f32[128,128], index: 0, kind: input, shape index: {}]   ;;  %s3132_s1 = inlined_call_operand.hbm [shape: f32[128,128], index: 1, kind: input, shape index: {}]   ;;  %s3133_s2 = inlined_call_operand.hbm [shape: f32[128,128], index: 2, kind: input, shape index: {}]   ;;  %s3134_s3 = inlined_call_operand.hbm [shape: f32[128,256], index: 3, kind: input, shape index: {}]   ;;  %s3135_s4 = inlined_call_operand.hbm [shape: f32[128,128], index: 4, kind: input, shape index: {}]   ;;  %s3136_s5 = inlined_call_operand.vmem [shape: f32[1,128], index: 5, kind: input, shape index: {}]   ;;  %s3137_s6 = inlined_call_operand.hbm [shape: f32[128,128], index: 6, kind: output, shape index: {}]  }
   0x1   :  { %12 = vsyncpa [#allocation10], 0 }
   0x2   :  { %13 = vsyncpa [#allocation13], 0 }
   0x3   :  { %14 = vsyncpa [#allocation8], 0  ;;  %s2502_s21 = smov [#allocation9]   ;;  %s2503_s23 = smov [#allocation12]  }
   0x4   :  { %s32_s22 = sshll.u32 %s2502_s21, 4  ;;  %s56_s24 = sshll.u32 %s2503_s23, 4  ;;  %s33_s22 = int_to_ptr.vmem [resolvable:$true] %s32_s22  ;;  %s2550_s24 = int_to_ptr.vmem [resolvable:$true] %s56_s24 }
   0x5   :  { %s2362_s27 = scalar_lea.hbm %s3132_s1, 2048 }
   0x6   :  { %p2363_p0 = scmp.ne.s32.totalorder %s3132_s1, %s2362_s27  ;;  %p2366_p1 = scmp.lt.u32.totalorder %s2362_s27, %s3132_s1 }
   0x8   :  { %p2368_p2 = pnand %p2366_p1, %p2363_p0 }
   0xa   :  { %2371 = shalt.err (!%p2368_p2)
}
   0xb   :  { %s2372_s8 = scalar_lea.vmem %s33_s22, 2048  ;;  %p2377_p4 = scmp.lt.s32.totalorder %s33_s22, %s33_s22 }
   0xc   :  { %p2373_p3 = scmp.ne.s32.totalorder %s33_s22, %s2372_s8  ;;  %p2378_p5 = scmp.lt.s32.totalorder %s2372_s8, %s2372_s8 }
   0xe   :  { %p2379_p6 = por %p2378_p5, %p2377_p4 }
  0x10   :  { %p2380_p7 = pnand %p2379_p6, %p2373_p3 }
  0x12   :  { %2383 = shalt.err (!%p2380_p7)
}
  0x13   :  { %s2504_s9 = smov 128   ;;  %s2505_s10 = smov 8  }
  0x14   :  { %38 = dma.hbm_to_vmem [thread:$0]  %s3132_s1, 2048, %s33_s22, [#allocation10], %s2504_s9, %s2504_s9, %s2505_s10  }
  0x15   :  { %s2384_s15 = scalar_lea.hbm %s3134_s3, 4096 }
  0x16   :  { %p2385_p8 = scmp.ne.s32.totalorder %s3134_s3, %s2384_s15  ;;  %p2388_p9 = scmp.lt.u32.totalorder %s2384_s15, %s3134_s3 }
  0x18   :  { %p2390_p10 = pnand %p2388_p9, %p2385_p8 }
  0x1a   :  { %2393 = shalt.err (!%p2390_p10)
}
  0x1b   :  { %s2394_s20 = scalar_lea.vmem %s2550_s24, 4096  ;;  %p2399_p12 = scmp.lt.s32.totalorder %s2550_s24, %s2550_s24 }
  0x1c   :  { %p2395_p11 = scmp.ne.s32.totalorder %s2550_s24, %s2394_s20  ;;  %p2400_p13 = scmp.lt.s32.totalorder %s2394_s20, %s2394_s20 }
  0x1e   :  { %p2401_p0 = por %p2400_p13, %p2399_p12 }
  0x20   :  { %p2402_p1 = pnand %p2401_p0, %p2395_p11 }
  0x22   :  { %2405 = shalt.err (!%p2402_p1)
}
  0x23   :  { %s2506_s1 = smov 256   ;;  %s2507_s21 = smov 16  }
  0x24   :  { %62 = dma.hbm_to_vmem [thread:$0]  %s3134_s3, 4096, %s2550_s24, [#allocation13], %s2506_s1, %s2506_s1, %s2507_s21  }
  0x25   :  { %s2508_s25 = smov [#allocation6]   ;;  %s2509_s27 = smov [#allocation11]  }
  0x26   :  { %s20_s26 = sshll.u32 %s2508_s25, 4  ;;  %s44_s28 = sshll.u32 %s2509_s27, 4  ;;  %s21_s26 = int_to_ptr.vmem [resolvable:$true] %s20_s26  ;;  %s2584_s28 = int_to_ptr.vmem [resolvable:$true] %s44_s28 }
  0x27   :  { %s2406_s7 = scalar_lea.hbm %s3131_s0, 2048 }
  0x28   :  { %p2407_p2 = scmp.ne.s32.totalorder %s3131_s0, %s2406_s7  ;;  %p2410_p3 = scmp.lt.u32.totalorder %s2406_s7, %s3131_s0 }
  0x2a   :  { %p2412_p4 = pnand %p2410_p3, %p2407_p2 }
  0x2c   :  { %2415 = shalt.err (!%p2412_p4)
}
  0x2d   :  { %s2416_s3 = scalar_lea.vmem %s21_s26, 2048  ;;  %p2421_p6 = scmp.lt.s32.totalorder %s21_s26, %s21_s26 }
  0x2e   :  { %p2417_p5 = scmp.ne.s32.totalorder %s21_s26, %s2416_s3  ;;  %p2422_p7 = scmp.lt.s32.totalorder %s2416_s3, %s2416_s3 }
  0x30   :  { %p2423_p8 = por %p2422_p7, %p2421_p6 }
  0x32   :  { %p2424_p9 = pnand %p2423_p8, %p2417_p5 }
  0x34   :  { %2427 = shalt.err (!%p2424_p9)
}
  0x35   :  { %26 = dma.hbm_to_vmem [thread:$0]  %s3131_s0, 2048, %s21_s26, [#allocation7], %s2504_s9, %s2504_s9, %s2505_s10  }
  0x36   :  { %s2428_s17 = scalar_lea.hbm %s3133_s2, 2048 }
  0x37   :  { %p2429_p10 = scmp.ne.s32.totalorder %s3133_s2, %s2428_s17  ;;  %p2432_p11 = scmp.lt.u32.totalorder %s2428_s17, %s3133_s2 }
  0x39   :  { %p2434_p12 = pnand %p2432_p11, %p2429_p10 }
  0x3b   :  { %2437 = shalt.err (!%p2434_p12)
}
  0x3c   :  { %s2438_s21 = scalar_lea.vmem %s2584_s28, 2048  ;;  %p2443_p0 = scmp.lt.s32.totalorder %s2584_s28, %s2584_s28 }
  0x3d   :  { %p2439_p13 = scmp.ne.s32.totalorder %s2584_s28, %s2438_s21  ;;  %p2444_p1 = scmp.lt.s32.totalorder %s2438_s21, %s2438_s21 }
  0x3f   :  { %p2445_p2 = por %p2444_p1, %p2443_p0 }
  0x41   :  { %p2446_p3 = pnand %p2445_p2, %p2439_p13 }
  0x43   :  { %2449 = shalt.err (!%p2446_p3)
}
  0x44   :  { %50 = dma.hbm_to_vmem [thread:$0]  %s3133_s2, 2048, %s2584_s28, [#allocation10], %s2504_s9, %s2504_s9, %s2505_s10  }
  0x45   :  { %s2510_s23 = smov [#allocation14]   ;;  %s2450_s29 = scalar_lea.hbm %s3135_s4, 2048 }
  0x46   :  { %s68_s25 = sshll.u32 %s2510_s23, 4  ;;  %p2451_p4 = scmp.ne.s32.totalorder %s3135_s4, %s2450_s29  ;;  %s69_s25 = int_to_ptr.vmem [resolvable:$true] %s68_s25 }
  0x47   :  { %p2454_p5 = scmp.lt.u32.totalorder %s2450_s29, %s3135_s4 }
  0x49   :  { %p2456_p6 = pnand %p2454_p5, %p2451_p4 }
  0x4b   :  { %2459 = shalt.err (!%p2456_p6)
}
  0x4c   :  { %s2460_s12 = scalar_lea.vmem %s69_s25, 2048  ;;  %p2465_p8 = scmp.lt.s32.totalorder %s69_s25, %s69_s25 }
  0x4d   :  { %p2461_p7 = scmp.ne.s32.totalorder %s69_s25, %s2460_s12  ;;  %p2466_p9 = scmp.lt.s32.totalorder %s2460_s12, %s2460_s12 }
  0x4f   :  { %p2467_p10 = por %p2466_p9, %p2465_p8 }
  0x51   :  { %p2468_p11 = pnand %p2467_p10, %p2461_p7 }
  0x53   :  { %2471 = shalt.err (!%p2468_p11)
}
  0x54   :  { %74 = dma.hbm_to_vmem [thread:$0]  %s3135_s4, 2048, %s69_s25, [#allocation13], %s2504_s9, %s2504_s9, %s2505_s10  }
  0x55   :  { %2494 = dma.done.wait [#allocation7], 2048  }
  0x56   :  { %2495 = vsyncadd [#allocation7], 4294965248 }
  0x57   :  { %2496 = dma.done.wait [#allocation10], 4096  }
  0x58   :  { %2497 = vsyncadd [#allocation10], 4294963200 }
  0x59   :  { %2498 = dma.done.wait [#allocation13], 6144  }
  0x5a   :  { %2499 = vsyncadd [#allocation13], 4294961152  ;;  %v2511_v0 = vmov 0.0   ;;  %v355_v1 = vld [vmem:[#allocation12 + $0x8] sm:$0xff]  ;;  %v357_v2 = vld [vmem:[#allocation12 + $0x18] sm:$0xff]  ;;  %vm289_vm0 = vcmask 7168  }
  0x5b   :  { %450 = vmatprep.mubr.f32.mxu1 %v2511_v0  ;;  %v354_v3 = vld [vmem:[#allocation12] sm:$0xff]  ;;  %v2107_v4 = vpack.c.bf16 %v357_v2, %v355_v1  ;;  %v356_v5 = vld [vmem:[#allocation12 + $0x10] sm:$0xff]  ;;  %v359_v6 = vld [vmem:[#allocation12 + $0x28] sm:$0xff]  ;;  %306 = vst.msk [vmem:[#allocation4] sm:$0xff] %vm289_vm0, %v2511_v0 }
  0x5c   :  { %v361_v7 = vld [vmem:[#allocation12 + $0x38] sm:$0xff]  ;;  %v2109_v8 = vpack.c.bf16 %v356_v5, %v354_v3  ;;  %v358_v10 = vld [vmem:[#allocation12 + $0x20] sm:$0xff]  ;;  %v360_v11 = vld [vmem:[#allocation12 + $0x30] sm:$0xff]  ;;  %307 = vst.msk [vmem:[#allocation4 + $0x8] sm:$0xff] %vm289_vm0, %v2511_v0 }
  0x5d   :  { %v2111_v9 = vpack.c.bf16 %v361_v7, %v359_v6  ;;  %v363_v12 = vld [vmem:[#allocation12 + $0x48] sm:$0xff]  ;;  %2108 = vmatprep.subr.bf16.mxu1 %v2107_v4  ;;  %v365_v13 = vld [vmem:[#allocation12 + $0x58] sm:$0xff]  ;;  %v2113_v14 = vpack.c.bf16 %v360_v11, %v358_v10  ;;  %v362_v16 = vld [vmem:[#allocation12 + $0x40] sm:$0xff]  ;;  %308 = vst.msk [vmem:[#allocation4 + $0x10] sm:$0xff] %vm289_vm0, %v2511_v0 }
  0x5e   :  { %2110 = vmatpush1.bf16.msra.mxu1 %v2109_v8  ;;  %v2115_v15 = vpack.c.bf16 %v365_v13, %v363_v12  ;;  %v364_v17 = vld [vmem:[#allocation12 + $0x50] sm:$0xff]  ;;  %v367_v18 = vld [vmem:[#allocation12 + $0x68] sm:$0xff]  ;;  %v369_v19 = vld [vmem:[#allocation12 + $0x78] sm:$0xff]  ;;  %309 = vst.msk [vmem:[#allocation4 + $0x18] sm:$0xff] %vm289_vm0, %v2511_v0 }
  0x5f   :  { %2112 = vmatprep.subr.bf16.mxu1 %v2111_v9  ;;  %v2117_v20 = vpack.c.bf16 %v364_v17, %v362_v16  ;;  %v2119_v21 = vpack.c.bf16 %v369_v19, %v367_v18  ;;  %v366_v22 = vld [vmem:[#allocation12 + $0x60] sm:$0xff]  ;;  %v368_v23 = vld [vmem:[#allocation12 + $0x70] sm:$0xff]  ;;  %v371_v24 = vld [vmem:[#allocation12 + $0x88] sm:$0xff]  ;;  %310 = vst.msk [vmem:[#allocation4 + $0x20] sm:$0xff] %vm289_vm0, %v2511_v0 }
  0x60   :  { %v373_v25 = vld [vmem:[#allocation12 + $0x98] sm:$0xff]  ;;  %v2121_v26 = vpack.c.bf16 %v368_v23, %v366_v22  ;;  %v370_v27 = vld [vmem:[#allocation12 + $0x80] sm:$0xff]  ;;  %v372_v29 = vld [vmem:[#allocation12 + $0x90] sm:$0xff]  ;;  %311 = vst.msk [vmem:[#allocation4 + $0x28] sm:$0xff] %vm289_vm0, %v2511_v0 }
  0x61   :  { %v2123_v28 = vpack.c.bf16 %v373_v25, %v371_v24  ;;  %v375_v30 = vld [vmem:[#allocation12 + $0xa8] sm:$0xff]  ;;  %v112_v31 = vld [vmem:[#allocation11] sm:$0xff]  ;;  %v377_v32 = vld [vmem:[#allocation12 + $0xb8] sm:$0xff]  ;;  %v2125_v37 = vpack.c.bf16 %v372_v29, %v370_v27  ;;  %312 = vst.msk [vmem:[#allocation4 + $0x30] sm:$0xff] %vm289_vm0, %v2511_v0 }
  0x62   :  { %2114 = vmatpush1.bf16.msra.mxu1 %v2113_v14  ;;  %v113_v33 = vld [vmem:[#allocation11 + $0x8] sm:$0xff]  ;;  %v114_v34 = vld [vmem:[#allocation11 + $0x10] sm:$0xff]  ;;  %v115_v36 = vld [vmem:[#allocation11 + $0x18] sm:$0xff]  ;;  %v2127_v41 = vpack.c.bf16 %v377_v32, %v375_v30  ;;  %313 = vst.msk [vmem:[#allocation4 + $0x38] sm:$0xff] %vm289_vm0, %v2511_v0 }
  0x63   :  { %2116 = vmatprep.subr.bf16.mxu1 %v2115_v15  ;;  %v2075_v35 = vpack.c.bf16 %v113_v33, %v112_v31  ;;  %v2079_v38 = vpack.c.bf16 %v115_v36, %v114_v34  ;;  %v116_v39 = vld [vmem:[#allocation11 + $0x20] sm:$0xff]  ;;  %v117_v40 = vld [vmem:[#allocation11 + $0x28] sm:$0xff]  ;;  %v376_v43 = vld [vmem:[#allocation12 + $0xb0] sm:$0xff]  ;;  %314 = vst.msk [vmem:[#allocation4 + $0x40] sm:$0xff] %vm289_vm0, %v2511_v0 }
  0x64   :  { %v374_v42 = vld [vmem:[#allocation12 + $0xa0] sm:$0xff]  ;;  %v379_v44 = vld [vmem:[#allocation12 + $0xc8] sm:$0xff]  ;;  %v381_v45 = vld [vmem:[#allocation12 + $0xd8] sm:$0xff]  ;;  %v2083_v46 = vpack.c.bf16 %v117_v40, %v116_v39  ;;  %315 = vst.msk [vmem:[#allocation4 + $0x48] sm:$0xff] %vm289_vm0, %v2511_v0 }
  0x65   :  { %2076 = vmatprep.subr.bf16.mxu0 %v2075_v35  ;;  %v2129_v47 = vpack.c.bf16 %v376_v43, %v374_v42  ;;  %v118_v48 = vld [vmem:[#allocation11 + $0x30] sm:$0xff]  ;;  %v119_v49 = vld [vmem:[#allocation11 + $0x38] sm:$0xff]  ;;  %v2131_v50 = vpack.c.bf16 %v381_v45, %v379_v44  ;;  %v378_v51 = vld [vmem:[#allocation12 + $0xc0] sm:$0xff]  ;;  %316 = vst.msk [vmem:[#allocation4 + $0x50] sm:$0xff] %vm289_vm0, %v2511_v0 }
  0x66   :  { %2118 = vmatpush1.bf16.msra.mxu1 %v2117_v20  ;;  %2078 = vmatpush3.bf16.msra.mxu0 %v2075_v35  ;;  %v380_v52 = vld [vmem:[#allocation12 + $0xd0] sm:$0xff]  ;;  %v96_v53 = vld [vmem:[#allocation6] sm:$0xff]  ;;  %v383_v54 = vld [vmem:[#allocation12 + $0xe8] sm:$0xff]  ;;  %v2087_v56 = vpack.c.bf16 %v119_v49, %v118_v48  ;;  %317 = vst.msk [vmem:[#allocation4 + $0x58] sm:$0xff] %vm289_vm0, %v2511_v0 }
  0x67   :  { %2120 = vmatprep.subr.bf16.mxu1 %v2119_v21  ;;  %2080 = vmatprep.subr.bf16.mxu0 %v2079_v38  ;;  %v385_v55 = vld [vmem:[#allocation12 + $0xf8] sm:$0xff]  ;;  %v2133_v57 = vpack.c.bf16 %v380_v52, %v378_v51  ;;  %v120_v58 = vld [vmem:[#allocation11 + $0x40] sm:$0xff]  ;;  %v121_v59 = vld [vmem:[#allocation11 + $0x48] sm:$0xff]  ;;  %318 = vst.msk [vmem:[#allocation4 + $0x60] sm:$0xff] %vm289_vm0, %v2511_v0 }
  0x68   :  { %1883 = vmatprep.mubr.f32.mxu0 %v96_v53  ;;  %v2135_v60 = vpack.c.bf16 %v385_v55, %v383_v54  ;;  %v382_v61 = vld [vmem:[#allocation12 + $0xe0] sm:$0xff]  ;;  %v384_v62 = vld [vmem:[#allocation12 + $0xf0] sm:$0xff]  ;;  %v2091_v63 = vpack.c.bf16 %v121_v59, %v120_v58  ;;  %v123_v3 = vld [vmem:[#allocation11 + $0x58] sm:$0xff]  ;;  %319 = vst.msk [vmem:[#allocation4 + $0x68] sm:$0xff] %vm289_vm0, %v2511_v0 }
  0x69   :  { %v2137_v1 = vpack.c.bf16 %v384_v62, %v382_v61  ;;  %v122_v2 = vld [vmem:[#allocation11 + $0x50] sm:$0xff]  ;;  %v338_v5 = vld [vmem:[#allocation9] sm:$0xff]  ;;  %v125_v7 = vld [vmem:[#allocation11 + $0x68] sm:$0xff]  ;;  %320 = vst.msk [vmem:[#allocation4 + $0x70] sm:$0xff] %vm289_vm0, %v2511_v0 }
  0x6a   :  { %2122 = vmatpush1.bf16.msra.mxu1 %v2121_v26  ;;  %2082 = vmatpush3.bf16.msra.mxu0 %v2079_v38  ;;  %v2095_v4 = vpack.c.bf16 %v123_v3, %v122_v2  ;;  %v124_v6 = vld [vmem:[#allocation11 + $0x60] sm:$0xff]  ;;  %v339_v9 = vld [vmem:[#allocation9 + $0x8] sm:$0xff]  ;;  %v126_v10 = vld [vmem:[#allocation11 + $0x70] sm:$0xff]  ;;  %321 = vst.msk [vmem:[#allocation4 + $0x78] sm:$0xff] %vm289_vm0, %v2511_v0 }
  0x6b   :  { %2124 = vmatprep.subr.bf16.mxu1 %v2123_v28  ;;  %2084 = vmatprep.subr.bf16.mxu0 %v2083_v46  ;;  %v2099_v8 = vpack.c.bf16 %v125_v7, %v124_v6  ;;  %v127_v11 = vld [vmem:[#allocation11 + $0x78] sm:$0xff]  ;;  %v340_v13 = vld [vmem:[#allocation9 + $0x10] sm:$0xff]  ;;  %v97_v15 = vld [vmem:[#allocation6 + $0x8] sm:$0xff] }
  0x6c   :  { %v2103_v12 = vpack.c.bf16 %v127_v11, %v126_v10  ;;  %v341_v14 = vld [vmem:[#allocation9 + $0x18] sm:$0xff]  ;;  %v98_v16 = vld [vmem:[#allocation6 + $0x10] sm:$0xff]  ;;  %v342_v17 = vld [vmem:[#allocation9 + $0x20] sm:$0xff] }
  0x6d   :  { %v99_v18 = vld [vmem:[#allocation6 + $0x18] sm:$0xff]  ;;  %v100_v19 = vld [vmem:[#allocation6 + $0x20] sm:$0xff]  ;;  %v343_v20 = vld [vmem:[#allocation9 + $0x28] sm:$0xff] }
  0x6e   :  { %2126 = vmatpush1.bf16.msra.mxu1 %v2125_v37  ;;  %2086 = vmatpush3.bf16.msra.mxu0 %v2083_v46  ;;  %v101_v21 = vld [vmem:[#allocation6 + $0x28] sm:$0xff]  ;;  %v102_v22 = vld [vmem:[#allocation6 + $0x30] sm:$0xff]  ;;  %v103_v24 = vld [vmem:[#allocation6 + $0x38] sm:$0xff] }
  0x6f   :  { %2128 = vmatprep.subr.bf16.mxu1 %v2127_v41  ;;  %2088 = vmatprep.subr.bf16.mxu0 %v2087_v56  ;;  %v344_v23 = vld [vmem:[#allocation9 + $0x30] sm:$0xff]  ;;  %v104_v25 = vld [vmem:[#allocation6 + $0x40] sm:$0xff]  ;;  %v345_v26 = vld [vmem:[#allocation9 + $0x38] sm:$0xff] }
  0x70   :  { %v105_v27 = vld [vmem:[#allocation6 + $0x48] sm:$0xff]  ;;  %v106_v28 = vld [vmem:[#allocation6 + $0x50] sm:$0xff]  ;;  %v346_v29 = vld [vmem:[#allocation9 + $0x40] sm:$0xff] }
  0x71   :  { %v107_v30 = vld [vmem:[#allocation6 + $0x58] sm:$0xff]  ;;  %v108_v31 = vld [vmem:[#allocation6 + $0x60] sm:$0xff]  ;;  %v347_v32 = vld [vmem:[#allocation9 + $0x48] sm:$0xff] }
  0x72   :  { %2130 = vmatpush1.bf16.msra.mxu1 %v2129_v47  ;;  %2090 = vmatpush3.bf16.msra.mxu0 %v2087_v56  ;;  %v109_v33 = vld [vmem:[#allocation6 + $0x68] sm:$0xff]  ;;  %v110_v34 = vld [vmem:[#allocation6 + $0x70] sm:$0xff]  ;;  %v111_v36 = vld [vmem:[#allocation6 + $0x78] sm:$0xff] }
  0x73   :  { %2132 = vmatprep.subr.bf16.mxu1 %v2131_v50  ;;  %2092 = vmatprep.subr.bf16.mxu0 %v2091_v63  ;;  %v348_v35 = vld [vmem:[#allocation9 + $0x50] sm:$0xff]  ;;  %v349_v37 = vld [vmem:[#allocation9 + $0x58] sm:$0xff]  ;;  %v350_v38 = vld [vmem:[#allocation9 + $0x60] sm:$0xff] }
  0x74   :  { %v351_v39 = vld [vmem:[#allocation9 + $0x68] sm:$0xff]  ;;  %v352_v40 = vld [vmem:[#allocation9 + $0x70] sm:$0xff]  ;;  %v353_v41 = vld [vmem:[#allocation9 + $0x78] sm:$0xff] }
  0x76   :  { %2134 = vmatpush1.bf16.msra.mxu1 %v2133_v57  ;;  %2094 = vmatpush3.bf16.msra.mxu0 %v2091_v63 }
  0x77   :  { %2136 = vmatprep.subr.bf16.mxu1 %v2135_v60  ;;  %2096 = vmatprep.subr.bf16.mxu0 %v2095_v4 }
  0x7a   :  { %2138 = vmatpush1.bf16.msra.mxu1 %v2137_v1  ;;  %2098 = vmatpush3.bf16.msra.mxu0 %v2095_v4 }
  0x7b   :  { %2100 = vmatprep.subr.bf16.mxu0 %v2099_v8 }
  0x7d   :  { %451 = vmatmul.mubr.f32.vlgmr.msra.gmra.mrb[0].mxu1 %v338_v5 }
  0x7e   :  { %456 = vmatprep.mubr.f32.mxu1 %v2511_v0  ;;  %2102 = vmatpush3.bf16.msra.mxu0 %v2099_v8 }
  0x7f   :  { %2104 = vmatprep.subr.bf16.mxu0 %v2103_v12 }
  0x81   :  { %457 = vmatmul.mubr.f32.gmra.mrb[2].mxu1 %v339_v9 }
  0x82   :  { %462 = vmatprep.mubr.f32.mxu1 %v2511_v0  ;;  %2106 = vmatpush3.bf16.msra.mxu0 %v2103_v12 }
  0x85   :  { %463 = vmatmul.mubr.f32.gmra.mrb[4].mxu1 %v340_v13  ;;  %1884 = vmatmul.mubr.f32.vlgmr.msra.gmra.mrb[0].mxu0 %v97_v15 }
  0x86   :  { %468 = vmatprep.mubr.f32.mxu1 %v2511_v0  ;;  %1886 = vmatprep.mubr.f32.mxu0 %v98_v16 }
  0x89   :  { %469 = vmatmul.mubr.f32.gmra.mrb[6].mxu1 %v341_v14  ;;  %1887 = vmatmul.mubr.f32.gmra.mrb[2].mxu0 %v99_v18 }
  0x8a   :  { %474 = vmatprep.mubr.f32.mxu1 %v2511_v0  ;;  %1889 = vmatprep.mubr.f32.mxu0 %v100_v19 }
  0x8d   :  { %475 = vmatmul.mubr.f32.gmra.mrb[8].mxu1 %v342_v17  ;;  %1890 = vmatmul.mubr.f32.gmra.mrb[4].mxu0 %v101_v21 }
  0x8e   :  { %480 = vmatprep.mubr.f32.mxu1 %v2511_v0  ;;  %1892 = vmatprep.mubr.f32.mxu0 %v102_v22 }
  0x91   :  { %481 = vmatmul.mubr.f32.gmra.mrb[10].mxu1 %v343_v20  ;;  %1893 = vmatmul.mubr.f32.gmra.mrb[6].mxu0 %v103_v24 }
  0x92   :  { %486 = vmatprep.mubr.f32.mxu1 %v2511_v0  ;;  %1895 = vmatprep.mubr.f32.mxu0 %v104_v25 }
  0x95   :  { %487 = vmatmul.mubr.f32.gmra.mrb[12].mxu1 %v344_v23  ;;  %1896 = vmatmul.mubr.f32.gmra.mrb[8].mxu0 %v105_v27 }
  0x96   :  { %492 = vmatprep.mubr.f32.mxu1 %v2511_v0  ;;  %1898 = vmatprep.mubr.f32.mxu0 %v106_v28 }
  0x99   :  { %493 = vmatmul.mubr.f32.gmra.mrb[14].mxu1 %v345_v26  ;;  %1899 = vmatmul.mubr.f32.gmra.mrb[10].mxu0 %v107_v30 }
  0x9a   :  { %498 = vmatprep.mubr.f32.mxu1 %v2511_v0  ;;  %1901 = vmatprep.mubr.f32.mxu0 %v108_v31 }
  0x9d   :  { %499 = vmatmul.mubr.f32.gmra.mrb[16].mxu1 %v346_v29  ;;  %1902 = vmatmul.mubr.f32.gmra.mrb[12].mxu0 %v109_v33 }
  0x9e   :  { %504 = vmatprep.mubr.f32.mxu1 %v2511_v0  ;;  %1904 = vmatprep.mubr.f32.mxu0 %v110_v34 }
  0xa1   :  { %505 = vmatmul.mubr.f32.gmra.mrb[18].mxu1 %v347_v32  ;;  %1905 = vmatmul.mubr.f32.gmra.mrb[14].mxu0 %v111_v36 }
  0xa2   :  { %510 = vmatprep.mubr.f32.mxu1 %v2511_v0 }
  0xa5   :  { %511 = vmatmul.mubr.f32.gmra.mrb[20].mxu1 %v348_v35 }
  0xa6   :  { %516 = vmatprep.mubr.f32.mxu1 %v2511_v0 }
  0xa9   :  { %517 = vmatmul.mubr.f32.gmra.mrb[22].mxu1 %v349_v37 }
  0xaa   :  { %522 = vmatprep.mubr.f32.mxu1 %v2511_v0 }
  0xad   :  { %523 = vmatmul.mubr.f32.gmra.mrb[24].mxu1 %v350_v38 }
  0xae   :  { %528 = vmatprep.mubr.f32.mxu1 %v2511_v0 }
  0xb1   :  { %529 = vmatmul.mubr.f32.gmra.mrb[26].mxu1 %v351_v39 }
  0xb2   :  { %534 = vmatprep.mubr.f32.mxu1 %v2511_v0 }
  0xb5   :  { %535 = vmatmul.mubr.f32.gmra.mrb[28].mxu1 %v352_v40 }
  0xb6   :  { %540 = vmatprep.mubr.f32.mxu1 %v2511_v0 }
  0xb9   :  { %541 = vmatmul.mubr.f32.gmra.mrb[30].mxu1 %v353_v41 }
 0x150   :  { %v452_v42 = vpop.f32.mrb[0].mxu1 }
 0x151   :  { %v454_v43 = vpop.f32.mrb[1].mxu1 }
 0x154   :  { %v458_v44 = vpop.f32.mrb[2].mxu1 }
 0x155   :  { %v2139_v45 = vpack.c.bf16 %v458_v44, %v452_v42  ;;  %v460_v46 = vpop.f32.mrb[3].mxu1  ;;  %v709_v44 = vlaneseq }
 0x156   :  { %v2171_v47 = vpack.c.bf16 %v460_v46, %v454_v43  ;;  %v2512_v43 = vmov -inf  }
 0x157   :  { %2140 = vmatprep.subr.bf16.mxu0 %v2139_v45  ;;  %290 = vst.msk [vmem:[#allocation3] sm:$0xff] %vm289_vm0, %v2512_v43  ;;  %291 = vst.msk [vmem:[#allocation3 + $0x8] sm:$0xff] %vm289_vm0, %v2512_v43 }
 0x158   :  { %v464_v48 = vpop.f32.mrb[4].mxu1  ;;  %2142 = vmatpush3.bf16.xpose.msra.mxu0 %v2139_v45  ;;  %2172 = vmatprep.subr.bf16.mxu1 %v2171_v47  ;;  %v2652_v54 = vpop.f32.mrb[0].mxu0  ;;  %292 = vst.msk [vmem:[#allocation3 + $0x10] sm:$0xff] %vm289_vm0, %v2512_v43  ;;  %293 = vst.msk [vmem:[#allocation3 + $0x18] sm:$0xff] %vm289_vm0, %v2512_v43  ;;  %v710_v45 = vand.u32 127, %v709_v44 }
 0x159   :  { %v466_v49 = vpop.f32.mrb[5].mxu1  ;;  %2174 = vmatpush3.bf16.msra.mxu1 %v2171_v47  ;;  %v194_v55 = vpop.f32.mrb[1].mxu0  ;;  %294 = vst.msk [vmem:[#allocation3 + $0x20] sm:$0xff] %vm289_vm0, %v2512_v43  ;;  %295 = vst.msk [vmem:[#allocation3 + $0x28] sm:$0xff] %vm289_vm0, %v2512_v43 }
 0x15a   :  { %1939 = vmatprep.mubr.f32.mxu0 %v194_v55  ;;  %296 = vst.msk [vmem:[#allocation3 + $0x30] sm:$0xff] %vm289_vm0, %v2512_v43  ;;  %297 = vst.msk [vmem:[#allocation3 + $0x38] sm:$0xff] %vm289_vm0, %v2512_v43  ;;  %vm713_vm1 = vcmp.lt.s32.totalorder %v710_v45, 16 }
 0x15b   :  { %298 = vst.msk [vmem:[#allocation3 + $0x40] sm:$0xff] %vm289_vm0, %v2512_v43  ;;  %299 = vst.msk [vmem:[#allocation3 + $0x48] sm:$0xff] %vm289_vm0, %v2512_v43 }
 0x15c   :  { %v470_v50 = vpop.f32.mrb[6].mxu1  ;;  %v2654_v58 = vpop.f32.mrb[2].mxu0  ;;  %300 = vst.msk [vmem:[#allocation3 + $0x50] sm:$0xff] %vm289_vm0, %v2512_v43  ;;  %301 = vst.msk [vmem:[#allocation3 + $0x58] sm:$0xff] %vm289_vm0, %v2512_v43 }
 0x15d   :  { %v2143_v51 = vpack.c.bf16 %v470_v50, %v464_v48  ;;  %v472_v52 = vpop.f32.mrb[7].mxu1  ;;  %v2656_v59 = vpop.f32.mrb[3].mxu0  ;;  %302 = vst.msk [vmem:[#allocation3 + $0x60] sm:$0xff] %vm289_vm0, %v2512_v43  ;;  %303 = vst.msk [vmem:[#allocation3 + $0x68] sm:$0xff] %vm289_vm0, %v2512_v43 }
 0x15e   :  { %v2175_v53 = vpack.c.bf16 %v472_v52, %v466_v49  ;;  %304 = vst.msk [vmem:[#allocation3 + $0x70] sm:$0xff] %vm289_vm0, %v2512_v43  ;;  %305 = vst.msk [vmem:[#allocation3 + $0x78] sm:$0xff] %vm289_vm0, %v2512_v43 }
 0x15f   :  { %2144 = vmatprep.subr.bf16.mxu0 %v2143_v51 }
 0x160   :  { %v476_v56 = vpop.f32.mrb[8].mxu1  ;;  %2146 = vmatpush3.bf16.xpose.msra.mxu0 %v2143_v51  ;;  %2176 = vmatprep.subr.bf16.mxu1 %v2175_v53  ;;  %v2658_v1 = vpop.f32.mrb[4].mxu0 }
 0x161   :  { %v478_v57 = vpop.f32.mrb[9].mxu1  ;;  %2178 = vmatpush3.bf16.msra.mxu1 %v2175_v53  ;;  %v2660_v2 = vpop.f32.mrb[5].mxu0 }
 0x162   :  { %v2846_v43 = vld [vmem:[#allocation3 + $0x40] sm:$0xff] }
 0x164   :  { %v482_v60 = vpop.f32.mrb[10].mxu1  ;;  %v2662_v5 = vpop.f32.mrb[6].mxu0 }
 0x165   :  { %v2147_v61 = vpack.c.bf16 %v482_v60, %v476_v56  ;;  %v484_v62 = vpop.f32.mrb[11].mxu1  ;;  %v224_v6 = vpop.f32.mrb[7].mxu0 }
 0x166   :  { %v2179_v63 = vpack.c.bf16 %v484_v62, %v478_v57 }
 0x167   :  { %2148 = vmatprep.subr.bf16.mxu0 %v2147_v61 }
 0x168   :  { %v488_v3 = vpop.f32.mrb[12].mxu1  ;;  %2150 = vmatpush3.bf16.xpose.msra.mxu0 %v2147_v61  ;;  %2180 = vmatprep.subr.bf16.mxu1 %v2179_v63  ;;  %v1897_v11 = vpop.f32.mrb[8].mxu0 }
 0x169   :  { %v490_v4 = vpop.f32.mrb[13].mxu1  ;;  %2182 = vmatpush3.bf16.msra.mxu1 %v2179_v63  ;;  %v234_v12 = vpop.f32.mrb[9].mxu0 }
 0x16c   :  { %v494_v7 = vpop.f32.mrb[14].mxu1  ;;  %v1900_v15 = vpop.f32.mrb[10].mxu0 }
 0x16d   :  { %v2151_v8 = vpack.c.bf16 %v494_v7, %v488_v3  ;;  %v496_v9 = vpop.f32.mrb[15].mxu1  ;;  %v244_v16 = vpop.f32.mrb[11].mxu0 }
 0x16e   :  { %v2183_v10 = vpack.c.bf16 %v496_v9, %v490_v4 }
 0x16f   :  { %2152 = vmatprep.subr.bf16.mxu0 %v2151_v8 }
 0x170   :  { %v500_v13 = vpop.f32.mrb[16].mxu1  ;;  %2154 = vmatpush3.bf16.xpose.msra.mxu0 %v2151_v8  ;;  %2184 = vmatprep.subr.bf16.mxu1 %v2183_v10  ;;  %v1903_v21 = vpop.f32.mrb[12].mxu0 }
 0x171   :  { %v502_v14 = vpop.f32.mrb[17].mxu1  ;;  %2186 = vmatpush3.bf16.msra.mxu1 %v2183_v10  ;;  %v254_v22 = vpop.f32.mrb[13].mxu0 }
 0x174   :  { %v506_v17 = vpop.f32.mrb[18].mxu1  ;;  %v1906_v25 = vpop.f32.mrb[14].mxu0 }
 0x175   :  { %v2155_v18 = vpack.c.bf16 %v506_v17, %v500_v13  ;;  %v508_v19 = vpop.f32.mrb[19].mxu1  ;;  %v264_v26 = vpop.f32.mrb[15].mxu0 }
 0x176   :  { %v2187_v20 = vpack.c.bf16 %v508_v19, %v502_v14  ;;  %v2789_v19 = vld [vmem:[#allocation3 + $0x8] sm:$0xff] }
 0x177   :  { %2156 = vmatprep.subr.bf16.mxu0 %v2155_v18 }
 0x178   :  { %v512_v23 = vpop.f32.mrb[20].mxu1  ;;  %2158 = vmatpush3.bf16.xpose.msra.mxu0 %v2155_v18  ;;  %2188 = vmatprep.subr.bf16.mxu1 %v2187_v20  ;;  %v2787_v18 = vld [vmem:[#allocation3 + $0x18] sm:$0xff] }
 0x179   :  { %v514_v24 = vpop.f32.mrb[21].mxu1  ;;  %2190 = vmatpush3.bf16.msra.mxu1 %v2187_v20 }
 0x17c   :  { %v518_v27 = vpop.f32.mrb[22].mxu1 }
 0x17d   :  { %v2159_v28 = vpack.c.bf16 %v518_v27, %v512_v23  ;;  %v520_v29 = vpop.f32.mrb[23].mxu1  ;;  %v2808_v27 = vld [vmem:[#allocation3 + $0x20] sm:$0xff] }
 0x17e   :  { %v2191_v30 = vpack.c.bf16 %v520_v29, %v514_v24 }
 0x17f   :  { %2160 = vmatprep.subr.bf16.mxu0 %v2159_v28 }
 0x180   :  { %v524_v31 = vpop.f32.mrb[24].mxu1  ;;  %2162 = vmatpush3.bf16.xpose.msra.mxu0 %v2159_v28  ;;  %2192 = vmatprep.subr.bf16.mxu1 %v2191_v30 }
 0x181   :  { %v526_v32 = vpop.f32.mrb[25].mxu1  ;;  %2194 = vmatpush3.bf16.msra.mxu1 %v2191_v30 }
 0x184   :  { %v530_v33 = vpop.f32.mrb[26].mxu1 }
 0x185   :  { %v2163_v34 = vpack.c.bf16 %v530_v33, %v524_v31  ;;  %v532_v35 = vpop.f32.mrb[27].mxu1 }
 0x186   :  { %v2195_v36 = vpack.c.bf16 %v532_v35, %v526_v32  ;;  %v2818_v32 = vld [vmem:[#allocation3 + $0x28] sm:$0xff]  ;;  %v2827_v35 = vld [vmem:[#allocation3 + $0x30] sm:$0xff] }
 0x187   :  { %2164 = vmatprep.subr.bf16.mxu0 %v2163_v34 }
 0x188   :  { %v536_v37 = vpop.f32.mrb[28].mxu1  ;;  %2166 = vmatpush3.bf16.xpose.msra.mxu0 %v2163_v34  ;;  %2196 = vmatprep.subr.bf16.mxu1 %v2195_v36 }
 0x189   :  { %v538_v38 = vpop.f32.mrb[29].mxu1  ;;  %2198 = vmatpush3.bf16.msra.mxu1 %v2195_v36 }
 0x18c   :  { %v542_v39 = vpop.f32.mrb[30].mxu1 }
 0x18d   :  { %v2167_v40 = vpack.c.bf16 %v542_v39, %v536_v37  ;;  %v544_v41 = vpop.f32.mrb[31].mxu1 }
 0x18e   :  { %v2199_v42 = vpack.c.bf16 %v544_v41, %v538_v38 }
 0x18f   :  { %2168 = vmatprep.subr.bf16.mxu0 %v2167_v40 }
 0x190   :  { %2170 = vmatpush3.bf16.xpose.msra.mxu0 %v2167_v40  ;;  %2200 = vmatprep.subr.bf16.mxu1 %v2199_v42  ;;  %v2837_v40 = vld [vmem:[#allocation3 + $0x38] sm:$0xff] }
 0x191   :  { %2202 = vmatpush3.bf16.msra.mxu1 %v2199_v42 }
 0x197   :  { %1940 = vmatmul.mubr.f32.vlgmr.msra.gmra.mrb[16].mxu0 %v2652_v54 }
 0x198   :  { %1942 = vmatprep.mubr.f32.mxu0 %v2656_v59 }
 0x19b   :  { %1943 = vmatmul.mubr.f32.gmra.mrb[18].mxu0 %v2654_v58 }
 0x19c   :  { %1945 = vmatprep.mubr.f32.mxu0 %v2660_v2 }
 0x19f   :  { %1946 = vmatmul.mubr.f32.gmra.mrb[20].mxu0 %v2658_v1  ;;  %v2513_v1 = vmov 0  }
 0x1a0   :  { %1948 = vmatprep.mubr.f32.mxu0 %v224_v6  ;;  %2264 = vset.pattern.permute.xlu0 %v2513_v1 }
 0x1a1   :  { %2265 = vset.pattern.permute.xlu1 %v2513_v1  ;;  %v2875_v1 = vld [vmem:[#allocation3 + $0x58] sm:$0xff] }
 0x1a3   :  { %1949 = vmatmul.mubr.f32.gmra.mrb[22].mxu0 %v2662_v5 }
 0x1a4   :  { %1951 = vmatprep.mubr.f32.mxu0 %v234_v12 }
 0x1a7   :  { %1952 = vmatmul.mubr.f32.gmra.mrb[24].mxu0 %v1897_v11 }
 0x1a8   :  { %1954 = vmatprep.mubr.f32.mxu0 %v244_v16 }
 0x1ab   :  { %1955 = vmatmul.mubr.f32.gmra.mrb[26].mxu0 %v1900_v15  ;;  %v2782_v15 = vld [vmem:[#allocation3] sm:$0xff] }
 0x1ac   :  { %1957 = vmatprep.mubr.f32.mxu0 %v254_v22 }
 0x1af   :  { %1958 = vmatmul.mubr.f32.gmra.mrb[28].mxu0 %v1903_v21 }
 0x1b0   :  { %1960 = vmatprep.mubr.f32.mxu0 %v264_v26 }
 0x1b3   :  { %1961 = vmatmul.mubr.f32.gmra.mrb[30].mxu0 %v1906_v25  ;;  %v2802_v25 = vld [vmem:[#allocation3 + $0x10] sm:$0xff] }
 0x26a   :  { %v1941_v46 = vpop.f32.mrb[16].mxu0 }
 0x26b   :  { %v629_v47 = vpop.f32.mrb[17].mxu0  ;;  %v2727_v52 = vsel %vm713_vm1, %v1941_v46, -1e+30 }
 0x26c   :  { %v2719_v48 = vsel %vm713_vm1, %v629_v47, -1e+30 }
 0x26d   :  { %746 = vmax.xlane.f32.xlu0 %v2719_v48 }
 0x26e   :  { %v1944_v49 = vpop.f32.mrb[18].mxu0 }
 0x26f   :  { %v2723_v50 = vsel %vm713_vm1, %v1944_v49, -1e+30  ;;  %v639_v51 = vpop.f32.mrb[19].mxu0  ;;  %v2856_v49 = vld [vmem:[#allocation3 + $0x48] sm:$0xff] }
 0x270   :  { %752 = vmax.xlane.f32.xlu1 %v2723_v50  ;;  %v2731_v0 = vsel %vm713_vm1, %v639_v51, -1e+30 }
 0x271   :  { %748 = vmax.xlane.f32.xlu0 %v2727_v52 }
 0x272   :  { %v1947_v53 = vpop.f32.mrb[20].mxu0 }
 0x273   :  { %v649_v54 = vpop.f32.mrb[21].mxu0  ;;  %v2738_v56 = vsel %vm713_vm1, %v1947_v53, -1e+30 }
 0x274   :  { %750 = vmax.xlane.f32.xlu1 %v2731_v0  ;;  %v2735_v55 = vsel %vm713_vm1, %v649_v54, -1e+30  ;;  %v2865_v54 = vld [vmem:[#allocation3 + $0x50] sm:$0xff] }
 0x275   :  { %754 = vmax.xlane.f32.xlu0 %v2735_v55 }
 0x276   :  { %v1950_v57 = vpop.f32.mrb[22].mxu0 }
 0x277   :  { %v659_v58 = vpop.f32.mrb[23].mxu0  ;;  %v2746_v60 = vsel %vm713_vm1, %v1950_v57, -1e+30 }
 0x278   :  { %756 = vmax.xlane.f32.xlu1 %v2738_v56  ;;  %v2743_v59 = vsel %vm713_vm1, %v659_v58, -1e+30 }
 0x279   :  { %758 = vmax.xlane.f32.xlu0 %v2743_v59 }
 0x27a   :  { %v1953_v61 = vpop.f32.mrb[24].mxu0 }
 0x27b   :  { %v669_v62 = vpop.f32.mrb[25].mxu0  ;;  %v2754_v2 = vsel %vm713_vm1, %v1953_v61, -1e+30 }
 0x27c   :  { %760 = vmax.xlane.f32.xlu1 %v2746_v60  ;;  %v2751_v63 = vsel %vm713_vm1, %v669_v62, -1e+30 }
 0x27d   :  { %762 = vmax.xlane.f32.xlu0 %v2751_v63 }
 0x27e   :  { %v1956_v3 = vpop.f32.mrb[26].mxu0 }
 0x27f   :  { %v679_v4 = vpop.f32.mrb[27].mxu0  ;;  %v2762_v6 = vsel %vm713_vm1, %v1956_v3, -1e+30 }
 0x280   :  { %764 = vmax.xlane.f32.xlu1 %v2754_v2  ;;  %v2759_v5 = vsel %vm713_vm1, %v679_v4, -1e+30 }
 0x281   :  { %766 = vmax.xlane.f32.xlu0 %v2759_v5 }
 0x282   :  { %v1959_v7 = vpop.f32.mrb[28].mxu0 }
 0x283   :  { %v689_v8 = vpop.f32.mrb[29].mxu0  ;;  %v2770_v10 = vsel %vm713_vm1, %v1959_v7, -1e+30  ;;  %v2885_v7 = vld [vmem:[#allocation3 + $0x60] sm:$0xff] }
 0x284   :  { %768 = vmax.xlane.f32.xlu1 %v2762_v6  ;;  %v2767_v9 = vsel %vm713_vm1, %v689_v8, -1e+30 }
 0x285   :  { %770 = vmax.xlane.f32.xlu0 %v2767_v9 }
 0x286   :  { %v1962_v11 = vpop.f32.mrb[30].mxu0 }
 0x287   :  { %v699_v12 = vpop.f32.mrb[31].mxu0  ;;  %v2778_v14 = vsel %vm713_vm1, %v1962_v11, -1e+30 }
 0x288   :  { %772 = vmax.xlane.f32.xlu1 %v2770_v10  ;;  %v2775_v13 = vsel %vm713_vm1, %v699_v12, -1e+30 }
 0x289   :  { %774 = vmax.xlane.f32.xlu0 %v2775_v13 }
 0x28c   :  { %776 = vmax.xlane.f32.xlu1 %v2778_v14 }
 0x2fa   :  { %v747_v16 = vpop.xlane.xlu0 %746 }
 0x2fb   :  { %v2785_v17 = vmax.f32 %v2782_v15, %v747_v16 }
 0x2fd   :  { %v794_v20 = vsub.f32 %v2782_v15, %v2785_v17  ;;  %1356 = vst.msk [vmem:[#allocation3] sm:$0xff] %vm289_vm0, %v2785_v17  ;;  %v753_v21 = vpop.xlane.xlu1 %752  ;;  %844 = vperm.xlu0 %2264, %v2785_v17  }
 0x2fe   :  { %v2797_v22 = vmax.f32 %v2787_v18, %v753_v21  ;;  %v749_v23 = vpop.xlane.xlu0 %748  ;;  %v2895_v21 = vld [vmem:[#allocation3 + $0x68] sm:$0xff] }
 0x2ff   :  { %v2800_v24 = vmax.f32 %v2789_v19, %v749_v23 }
 0x300   :  { %1359 = vst.msk [vmem:[#allocation3 + $0x18] sm:$0xff] %vm289_vm0, %v2797_v22 }
 0x301   :  { %1357 = vst.msk [vmem:[#allocation3 + $0x8] sm:$0xff] %vm289_vm0, %v2800_v24  ;;  %v751_v29 = vpop.xlane.xlu1 %750  ;;  %849 = vperm.xlu1 %2265, %v2800_v24  }
 0x302   :  { %v2816_v30 = vmax.f32 %v2802_v25, %v751_v29  ;;  %v755_v31 = vpop.xlane.xlu0 %754 }
 0x303   :  { %v2821_v33 = vmax.f32 %v2808_v27, %v755_v31  ;;  %v2905_v31 = vld [vmem:[#allocation3 + $0x70] sm:$0xff] }
 0x304   :  { %1358 = vst.msk [vmem:[#allocation3 + $0x10] sm:$0xff] %vm289_vm0, %v2816_v30 }
 0x305   :  { %v757_v36 = vpop.xlane.xlu1 %756  ;;  %859 = vperm.xlu1 %2265, %v2797_v22   ;;  %1360 = vst.msk [vmem:[#allocation3 + $0x20] sm:$0xff] %vm289_vm0, %v2821_v33 }
 0x306   :  { %v2835_v38 = vmax.f32 %v2818_v32, %v757_v36  ;;  %v759_v39 = vpop.xlane.xlu0 %758 }
 0x307   :  { %v2840_v41 = vmax.f32 %v2827_v35, %v759_v39 }
 0x308   :  { %1361 = vst.msk [vmem:[#allocation3 + $0x28] sm:$0xff] %vm289_vm0, %v2835_v38 }
 0x309   :  { %v761_v44 = vpop.xlane.xlu1 %760  ;;  %854 = vperm.xlu1 %2265, %v2816_v30   ;;  %1362 = vst.msk [vmem:[#allocation3 + $0x30] sm:$0xff] %vm289_vm0, %v2840_v41 }
 0x30a   :  { %v2854_v46 = vmax.f32 %v2837_v40, %v761_v44  ;;  %v763_v47 = vpop.xlane.xlu0 %762 }
 0x30b   :  { %v2859_v51 = vmax.f32 %v2846_v43, %v763_v47 }
 0x30c   :  { %1363 = vst.msk [vmem:[#allocation3 + $0x38] sm:$0xff] %vm289_vm0, %v2854_v46 }
 0x30d   :  { %v765_v57 = vpop.xlane.xlu1 %764  ;;  %869 = vperm.xlu1 %2265, %v2835_v38   ;;  %v802_v58 = vsub.f32 %v2846_v43, %v2859_v51  ;;  %1364 = vst.msk [vmem:[#allocation3 + $0x40] sm:$0xff] %vm289_vm0, %v2859_v51  ;;  %v3142_v43 = vsub.f32 %v2787_v18, %v2797_v22 }
 0x30e   :  { %v2873_v61 = vmax.f32 %v2856_v49, %v765_v57  ;;  %v767_v62 = vpop.xlane.xlu0 %766  ;;  %v2915_v57 = vld [vmem:[#allocation3 + $0x78] sm:$0xff] }
 0x30f   :  { %v2878_v3 = vmax.f32 %v2865_v54, %v767_v62 }
 0x310   :  { %1365 = vst.msk [vmem:[#allocation3 + $0x48] sm:$0xff] %vm289_vm0, %v2873_v61  ;;  %889 = vperm.xlu0 %2264, %v2873_v61  }
 0x311   :  { %v769_v8 = vpop.xlane.xlu1 %768  ;;  %864 = vperm.xlu1 %2265, %v2821_v33   ;;  %1366 = vst.msk [vmem:[#allocation3 + $0x50] sm:$0xff] %vm289_vm0, %v2878_v3  ;;  %v3141_v17 = vsub.f32 %v2865_v54, %v2878_v3 }
 0x312   :  { %v2893_v12 = vmax.f32 %v2875_v1, %v769_v8  ;;  %v771_v16 = vpop.xlane.xlu0 %770 }
 0x313   :  { %v2898_v23 = vmax.f32 %v2885_v7, %v771_v16 }
 0x314   :  { %1367 = vst.msk [vmem:[#allocation3 + $0x58] sm:$0xff] %vm289_vm0, %v2893_v12  ;;  %899 = vperm.xlu0 %2264, %v2893_v12  }
 0x315   :  { %v773_v36 = vpop.xlane.xlu1 %772  ;;  %879 = vperm.xlu1 %2265, %v2854_v46   ;;  %1368 = vst.msk [vmem:[#allocation3 + $0x60] sm:$0xff] %vm289_vm0, %v2898_v23  ;;  %v3145_v18 = vsub.f32 %v2885_v7, %v2898_v23 }
 0x316   :  { %v2913_v44 = vmax.f32 %v2895_v21, %v773_v36  ;;  %v775_v47 = vpop.xlane.xlu0 %774 }
 0x317   :  { %v2918_v62 = vmax.f32 %v2905_v31, %v775_v47  ;;  %v834_v22 = vmul.f32 1.442695, %v3145_v18 }
 0x318   :  { %1369 = vst.msk [vmem:[#allocation3 + $0x68] sm:$0xff] %vm289_vm0, %v2913_v44  ;;  %909 = vperm.xlu0 %2264, %v2913_v44  }
 0x319   :  { %874 = vperm.xlu1 %2265, %v2840_v41   ;;  %v777_v16 = vpop.xlane.xlu1 %776  ;;  %1370 = vst.msk [vmem:[#allocation3 + $0x70] sm:$0xff] %vm289_vm0, %v2918_v62 }
 0x31a   :  { %v2931_v47 = vmax.f32 %v2915_v57, %v777_v16 }
 0x31c   :  { %1371 = vst.msk [vmem:[#allocation3 + $0x78] sm:$0xff] %vm289_vm0, %v2931_v47  ;;  %919 = vperm.xlu0 %2264, %v2931_v47  }
 0x31d   :  { %884 = vperm.xlu1 %2265, %v2859_v51  }
 0x321   :  { %894 = vperm.xlu1 %2265, %v2878_v3  }
 0x325   :  { %904 = vperm.xlu1 %2265, %v2898_v23   ;;  %v3148_v23 = vsub.f32 %v2827_v35, %v2840_v41  ;;  %v3151_v35 = vsub.f32 %v2915_v57, %v2931_v47 }
 0x327   :  { %v840_v41 = vmul.f32 1.442695, %v3151_v35  ;;  %v1533_v35 = vld [vmem:[#allocation14 + $0x70] sm:$0xff] }
 0x329   :  { %914 = vperm.xlu1 %2265, %v2918_v62  }
 0x37c   :  { %v845_v36 = vpop.permute.xlu0 %844 }
 0x37d   :  { %v922_v16 = vsub.f32 %v2719_v48, %v845_v36 }
 0x37f   :  { %v938_v45 = vmul.f32 1.442695, %v922_v16 }
 0x380   :  { %v850_v8 = vpop.permute.xlu1 %849 }
 0x381   :  { %2266 = vpow2.f32 %v938_v45  ;;  %v923_v53 = vsub.f32 %v2727_v52, %v850_v8 }
 0x383   :  { %v940_v42 = vmul.f32 1.442695, %v923_v53 }
 0x384   :  { %v860_v39 = vpop.permute.xlu1 %859 }
 0x385   :  { %2268 = vpow2.f32 %v940_v42  ;;  %v925_v37 = vsub.f32 %v2723_v50, %v860_v39 }
 0x387   :  { %v944_v29 = vmul.f32 1.442695, %v925_v37 }
 0x388   :  { %v855_v26 = vpop.permute.xlu1 %854 }
 0x389   :  { %2270 = vpow2.f32 %v944_v29  ;;  %v924_v11 = vsub.f32 %v2731_v0, %v855_v26 }
 0x38b   :  { %v2267_v34 = vpop.eup %2266  ;;  %v942_v4 = vmul.f32 1.442695, %v924_v11 }
 0x38c   :  { %v870_v28 = vpop.permute.xlu1 %869  ;;  %1002 = vadd.xlane.f32.xlu1 %v2267_v34  ;;  %1995 = vmatprep.mubr.f32.mxu1 %v2267_v34 }
 0x38d   :  { %2272 = vpow2.f32 %v942_v4  ;;  %v927_v48 = vsub.f32 %v2738_v56, %v870_v28 }
 0x38f   :  { %v2269_v45 = vpop.eup %2268  ;;  %v890_v52 = vpop.permute.xlu0 %889  ;;  %v948_v37 = vmul.f32 1.442695, %v927_v48 }
 0x390   :  { %v931_v53 = vsub.f32 %v2754_v2, %v890_v52  ;;  %v865_v42 = vpop.permute.xlu1 %864  ;;  %1004 = vadd.xlane.f32.xlu0 %v2269_v45  ;;  %1996 = vmatmul.mubr.f32.vlgmr.msra.gmra.mrb[32].mxu1 %v2269_v45 }
 0x391   :  { %v926_v50 = vsub.f32 %v2735_v55, %v865_v42 }
 0x392   :  { %v956_v29 = vmul.f32 1.442695, %v931_v53 }
 0x393   :  { %v2271_v0 = vpop.eup %2270  ;;  %v946_v26 = vmul.f32 1.442695, %v926_v50  ;;  %v900_v11 = vpop.permute.xlu0 %899 }
 0x394   :  { %2274 = vpow2.f32 %v956_v29  ;;  %v933_v34 = vsub.f32 %v2762_v6, %v900_v11  ;;  %v880_v4 = vpop.permute.xlu1 %879  ;;  %1008 = vadd.xlane.f32.xlu0 %v2271_v0 }
 0x395   :  { %2276 = vpow2.f32 %v946_v26  ;;  %v929_v2 = vsub.f32 %v2746_v60, %v880_v4 }
 0x396   :  { %2278 = vpow2.f32 %v948_v37  ;;  %v960_v56 = vmul.f32 1.442695, %v933_v34 }
 0x397   :  { %v2273_v28 = vpop.eup %2272  ;;  %v952_v8 = vmul.f32 1.442695, %v929_v2  ;;  %v910_v48 = vpop.permute.xlu0 %909 }
 0x398   :  { %2280 = vpow2.f32 %v960_v56  ;;  %v875_v39 = vpop.permute.xlu1 %874  ;;  %1006 = vadd.xlane.f32.xlu0 %v2273_v28  ;;  %1998 = vmatprep.mubr.f32.mxu1 %v2273_v28  ;;  %v935_v37 = vsub.f32 %v2770_v10, %v910_v48  ;;  %v826_v48 = vmul.f32 1.442695, %v802_v58 }
 0x399   :  { %v928_v55 = vsub.f32 %v2743_v59, %v875_v39  ;;  %1999 = vmatmul.mubr.f32.gmra.mrb[34].mxu1 %v2271_v0 }
 0x39a   :  { %v964_v11 = vmul.f32 1.442695, %v935_v37 }
 0x39b   :  { %v950_v36 = vmul.f32 1.442695, %v928_v55  ;;  %v920_v29 = vpop.permute.xlu0 %919 }
 0x39c   :  { %v885_v16 = vpop.permute.xlu1 %884  ;;  %v937_v34 = vsub.f32 %v2778_v14, %v920_v29 }
 0x39d   :  { %2282 = vpow2.f32 %v950_v36  ;;  %v930_v6 = vsub.f32 %v2751_v63, %v885_v16  ;;  %v810_v16 = vmul.f32 1.442695, %v794_v20  ;;  %v830_v20 = vmul.f32 1.442695, %v3141_v17 }
 0x39e   :  { %v2275_v45 = vpop.eup %2274  ;;  %2284 = vpow2.f32 %v952_v8  ;;  %v968_v10 = vmul.f32 1.442695, %v937_v34  ;;  %v1522_v34 = vld [vmem:[#allocation14 + $0x18] sm:$0xff] }
 0x39f   :  { %v2277_v52 = vpop.eup %2276  ;;  %v954_v53 = vmul.f32 1.442695, %v930_v6  ;;  %1020 = vadd.xlane.f32.xlu1 %v2275_v45  ;;  %v3138_v6 = vsub.f32 %v2789_v19, %v2800_v24  ;;  %v816_v19 = vmul.f32 1.442695, %v3142_v43  ;;  %v3143_v24 = vsub.f32 %v2875_v1, %v2893_v12  ;;  %v1531_v43 = vld [vmem:[#allocation14 + $0x60] sm:$0xff] }
 0x3a0   :  { %v2279_v60 = vpop.eup %2278  ;;  %v895_v42 = vpop.permute.xlu1 %894  ;;  %2001 = vmatprep.mubr.f32.mxu1 %v2277_v52  ;;  %v3146_v1 = vsub.f32 %v2818_v32, %v2835_v38  ;;  %v822_v32 = vmul.f32 1.442695, %v3148_v23  ;;  %v3149_v38 = vsub.f32 %v2905_v31, %v2918_v62  ;;  %v981_v23 = vld [vmem:[#allocation4 + $0x58] sm:$0xff] }
 0x3a1   :  { %2286 = vpow2.f32 %v954_v53  ;;  %v932_v50 = vsub.f32 %v2759_v5, %v895_v42  ;;  %2002 = vmatmul.mubr.f32.gmra.mrb[36].mxu1 %v2279_v60 }
 0x3a2   :  { %v2281_v59 = vpop.eup %2280  ;;  %v820_v3 = vmul.f32 1.442695, %v3146_v1  ;;  %v979_v1 = vld [vmem:[#allocation4 + $0x48] sm:$0xff] }
 0x3a3   :  { %v958_v0 = vmul.f32 1.442695, %v932_v50  ;;  %1024 = vadd.xlane.f32.xlu1 %v2281_v59  ;;  %v3150_v50 = vsub.f32 %v2837_v40, %v2854_v46 }
 0x3a4   :  { %v905_v26 = vpop.permute.xlu1 %904 }
 0x3a5   :  { %2288 = vpow2.f32 %v958_v0  ;;  %v934_v63 = vsub.f32 %v2767_v9, %v905_v26  ;;  %v1519_v0 = vld [vmem:[#allocation14] sm:$0xff]  ;;  %v1520_v26 = vld [vmem:[#allocation14 + $0x8] sm:$0xff] }
 0x3a7   :  { %v2283_v4 = vpop.eup %2282  ;;  %v962_v56 = vmul.f32 1.442695, %v934_v63  ;;  %v1521_v63 = vld [vmem:[#allocation14 + $0x10] sm:$0xff] }
 0x3a8   :  { %v2285_v2 = vpop.eup %2284  ;;  %v915_v28 = vpop.permute.xlu1 %914  ;;  %2004 = vmatprep.mubr.f32.mxu1 %v2283_v4 }
 0x3a9   :  { %2290 = vpow2.f32 %v962_v56  ;;  %v936_v5 = vsub.f32 %v2775_v13, %v915_v28  ;;  %2005 = vmatmul.mubr.f32.gmra.mrb[38].mxu1 %v2285_v2  ;;  %v1523_v56 = vld [vmem:[#allocation14 + $0x20] sm:$0xff] }
 0x3aa   :  { %2292 = vpow2.f32 %v964_v11  ;;  %v2203_v11 = vpack.c.bf16 %v1520_v26, %v1519_v0  ;;  %v978_v0 = vld [vmem:[#allocation4 + $0x40] sm:$0xff] }
 0x3ab   :  { %v2287_v39 = vpop.eup %2286  ;;  %v966_v55 = vmul.f32 1.442695, %v936_v5  ;;  %v1525_v5 = vld [vmem:[#allocation14 + $0x30] sm:$0xff] }
 0x3ac   :  { %1018 = vadd.xlane.f32.xlu0 %v2287_v39  ;;  %2007 = vmatprep.mubr.f32.mxu1 %v2287_v39  ;;  %v970_v39 = vld [vmem:[#allocation4] sm:$0xff] }
 0x3ad   :  { %2294 = vpow2.f32 %v966_v55  ;;  %2008 = vmatmul.mubr.f32.gmra.mrb[40].mxu1 %v2275_v45  ;;  %v812_v45 = vmul.f32 1.442695, %v3138_v6  ;;  %2204 = vmatprep.subr.bf16.mxu0 %v2203_v11 }
 0x3ae   :  { %2296 = vpow2.f32 %v968_v10  ;;  %2235 = vmatprep.subr.bf16.mxu1 %v2203_v11  ;;  %2206 = vmatpush3.bf16.msra.mxu0 %v2203_v11  ;;  %v1526_v10 = vld [vmem:[#allocation14 + $0x38] sm:$0xff] }
 0x3af   :  { %v2289_v9 = vpop.eup %2288  ;;  %2298 = vpow2.f32 %v810_v16  ;;  %2243 = vmatpush3.bf16.msra.mxu1 %v2203_v11  ;;  %v2215_v55 = vpack.c.bf16 %v1526_v10, %v1525_v5 }
 0x3b0   :  { %1010 = vadd.xlane.f32.xlu0 %v2277_v52  ;;  %2010 = vmatprep.mubr.f32.mxu1 %v2289_v9  ;;  %v3139_v52 = vsub.f32 %v2856_v49, %v2873_v61  ;;  %2300 = vpow2.f32 %v826_v48  ;;  %v832_v49 = vmul.f32 1.442695, %v3143_v24 }
 0x3b1   :  { %1022 = vadd.xlane.f32.xlu1 %v2289_v9  ;;  %2011 = vmatmul.mubr.f32.gmra.mrb[42].mxu1 %v2281_v59  ;;  %2302 = vpow2.f32 %v812_v45  ;;  %v824_v59 = vmul.f32 1.442695, %v3150_v50  ;;  %v1529_v45 = vld [vmem:[#allocation14 + $0x50] sm:$0xff] }
 0x3b2   :  { %v828_v53 = vmul.f32 1.442695, %v3139_v52  ;;  %v1530_v52 = vld [vmem:[#allocation14 + $0x58] sm:$0xff] }
 0x3b3   :  { %v2291_v14 = vpop.eup %2290  ;;  %v2223_v17 = vpack.c.bf16 %v1530_v52, %v1529_v45  ;;  %v982_v45 = vld [vmem:[#allocation4 + $0x60] sm:$0xff] }
 0x3b4   :  { %v2293_v8 = vpop.eup %2292  ;;  %1012 = vadd.xlane.f32.xlu0 %v2279_v60  ;;  %2013 = vmatprep.mubr.f32.mxu1 %v2291_v14  ;;  %v3140_v60 = vsub.f32 %v2802_v25, %v2816_v30  ;;  %2304 = vpow2.f32 %v828_v53  ;;  %v3144_v25 = vsub.f32 %v2808_v27, %v2821_v33  ;;  %v3147_v27 = vsub.f32 %v2895_v21, %v2913_v44 }
 0x3b5   :  { %1028 = vadd.xlane.f32.xlu1 %v2293_v8  ;;  %2014 = vmatmul.mubr.f32.gmra.mrb[44].mxu1 %v2293_v8  ;;  %v838_v21 = vmul.f32 1.442695, %v3149_v38  ;;  %v1528_v8 = vld [vmem:[#allocation14 + $0x48] sm:$0xff] }
 0x3b6   :  { %v814_v15 = vmul.f32 1.442695, %v3140_v60  ;;  %v818_v30 = vmul.f32 1.442695, %v3144_v25  ;;  %v836_v33 = vmul.f32 1.442695, %v3147_v27 }
 0x3b7   :  { %v2295_v13 = vpop.eup %2294  ;;  %v973_v60 = vld [vmem:[#allocation4 + $0x18] sm:$0xff] }
 0x3b8   :  { %v2297_v36 = vpop.eup %2296  ;;  %1014 = vadd.xlane.f32.xlu0 %v2283_v4  ;;  %2016 = vmatprep.mubr.f32.mxu1 %v2295_v13  ;;  %2306 = vpow2.f32 %v814_v15  ;;  %v2207_v4 = vpack.c.bf16 %v1522_v34, %v1521_v63  ;;  %v974_v34 = vld [vmem:[#allocation4 + $0x20] sm:$0xff] }
 0x3b9   :  { %1026 = vadd.xlane.f32.xlu1 %v2291_v14  ;;  %2017 = vmatmul.mubr.f32.gmra.mrb[46].mxu1 %v2297_v36  ;;  %2308 = vpow2.f32 %v830_v20  ;;  %v2982_v51 = vpop.eup %2298  ;;  %v1527_v14 = vld [vmem:[#allocation14 + $0x40] sm:$0xff] }
 0x3ba   :  { %v2984_v58 = vpop.eup %2300  ;;  %2310 = vpow2.f32 %v816_v19  ;;  %2208 = vmatprep.subr.bf16.mxu0 %v2207_v4  ;;  %2236 = vmatprep.subr.bf16.mxu1 %v2207_v4  ;;  %v986_v9 = vmul.f32 %v2982_v51, %v970_v39  ;;  %v2219_v48 = vpack.c.bf16 %v1528_v8, %v1527_v14  ;;  %v1532_v19 = vld [vmem:[#allocation14 + $0x68] sm:$0xff] }
 0x3bb   :  { %2312 = vpow2.f32 %v832_v49  ;;  %v2994_v54 = vpop.eup %2302  ;;  %2210 = vmatpush3.bf16.msra.mxu0 %v2207_v4  ;;  %2244 = vmatpush3.bf16.msra.mxu1 %v2207_v4  ;;  %v972_v49 = vld [vmem:[#allocation4 + $0x10] sm:$0xff]  ;;  %v2227_v25 = vpack.c.bf16 %v1532_v19, %v1531_v43  ;;  %v975_v39 = vld [vmem:[#allocation4 + $0x28] sm:$0xff]  ;;  %v985_v19 = vld [vmem:[#allocation4 + $0x78] sm:$0xff] }
 0x3bc   :  { %1016 = vadd.xlane.f32.xlu0 %v2285_v2  ;;  %2314 = vpow2.f32 %v818_v30  ;;  %v1524_v2 = vld [vmem:[#allocation14 + $0x28] sm:$0xff] }
 0x3bd   :  { %1032 = vadd.xlane.f32.xlu1 %v2297_v36  ;;  %2316 = vpow2.f32 %v834_v22  ;;  %v2211_v28 = vpack.c.bf16 %v1524_v2, %v1523_v56  ;;  %v971_v36 = vld [vmem:[#allocation4 + $0x8] sm:$0xff]  ;;  %v980_v2 = vld [vmem:[#allocation4 + $0x50] sm:$0xff] }
 0x3be   :  { %v2996_v61 = vpop.eup %2304  ;;  %2318 = vpow2.f32 %v820_v3  ;;  %v987_v6 = vmul.f32 %v2994_v54, %v971_v36  ;;  %v983_v8 = vld [vmem:[#allocation4 + $0x68] sm:$0xff] }
 0x3bf   :  { %2320 = vpow2.f32 %v836_v33  ;;  %2212 = vmatprep.subr.bf16.mxu0 %v2211_v28  ;;  %2237 = vmatprep.subr.bf16.mxu1 %v2211_v28  ;;  %v995_v27 = vmul.f32 %v2996_v61, %v979_v1 }
 0x3c0   :  { %2322 = vpow2.f32 %v822_v32  ;;  %2214 = vmatpush3.bf16.msra.mxu0 %v2211_v28  ;;  %2245 = vmatpush3.bf16.msra.mxu1 %v2211_v28 }
 0x3c1   :  { %1030 = vadd.xlane.f32.xlu1 %v2295_v13  ;;  %2324 = vpow2.f32 %v838_v21  ;;  %2216 = vmatprep.subr.bf16.mxu0 %v2215_v55 }
 0x3c2   :  { %v3006_v7 = vpop.eup %2306  ;;  %2326 = vpow2.f32 %v824_v59  ;;  %2238 = vmatprep.subr.bf16.mxu1 %v2215_v55 }
 0x3c3   :  { %v3008_v12 = vpop.eup %2308  ;;  %2328 = vpow2.f32 %v840_v41  ;;  %v988_v30 = vmul.f32 %v3006_v7, %v972_v49  ;;  %v1534_v41 = vld [vmem:[#allocation14 + $0x78] sm:$0xff] }
 0x3c4   :  { %v3018_v44 = vpop.eup %2310  ;;  %2218 = vmatpush3.bf16.msra.mxu0 %v2215_v55  ;;  %2246 = vmatpush3.bf16.msra.mxu1 %v2215_v55  ;;  %v996_v5 = vmul.f32 %v3008_v12, %v980_v2 }
 0x3c5   :  { %v3020_v42 = vpop.eup %2312  ;;  %2220 = vmatprep.subr.bf16.mxu0 %v2219_v48  ;;  %2239 = vmatprep.subr.bf16.mxu1 %v2219_v48  ;;  %v989_v20 = vmul.f32 %v3018_v44, %v973_v60 }
 0x3c6   :  { %v3030_v31 = vpop.eup %2314  ;;  %v997_v38 = vmul.f32 %v3020_v42, %v981_v23 }
 0x3c7   :  { %v3032_v62 = vpop.eup %2316  ;;  %v990_v28 = vmul.f32 %v3030_v31, %v974_v34 }
 0x3c8   :  { %v3036_v40 = vpop.eup %2318  ;;  %2222 = vmatpush3.bf16.msra.mxu0 %v2219_v48  ;;  %2247 = vmatpush3.bf16.msra.mxu1 %v2219_v48  ;;  %v976_v48 = vld [vmem:[#allocation4 + $0x30] sm:$0xff] }
 0x3c9   :  { %v3038_v46 = vpop.eup %2320  ;;  %2224 = vmatprep.subr.bf16.mxu0 %v2223_v17  ;;  %2240 = vmatprep.subr.bf16.mxu1 %v2223_v17 }
 0x3ca   :  { %v3042_v57 = vpop.eup %2322 }
 0x3cb   :  { %v3044_v47 = vpop.eup %2324  ;;  %v992_v60 = vmul.f32 %v3042_v57, %v976_v48 }
 0x3cc   :  { %v3048_v37 = vpop.eup %2326  ;;  %2226 = vmatpush3.bf16.msra.mxu0 %v2223_v17  ;;  %2248 = vmatpush3.bf16.msra.mxu1 %v2223_v17  ;;  %v977_v17 = vld [vmem:[#allocation4 + $0x38] sm:$0xff] }
 0x3cd   :  { %v3050_v29 = vpop.eup %2328  ;;  %2228 = vmatprep.subr.bf16.mxu0 %v2227_v25  ;;  %2241 = vmatprep.subr.bf16.mxu1 %v2227_v25  ;;  %v993_v49 = vmul.f32 %v3048_v37, %v977_v17 }
 0x3d0   :  { %2230 = vmatpush3.bf16.msra.mxu0 %v2227_v25  ;;  %2249 = vmatpush3.bf16.msra.mxu1 %v2227_v25 }
 0x3d2   :  { %1125 = vperm.xlu1 %2265, %v2984_v58   ;;  %1085 = vperm.xlu0 %2264, %v2982_v51  }
 0x3d6   :  { %1090 = vperm.xlu1 %2265, %v2994_v54   ;;  %1130 = vperm.xlu0 %2264, %v2996_v61   ;;  %v2231_v61 = vpack.c.bf16 %v1534_v41, %v1533_v35 }
 0x3d8   :  { %2232 = vmatprep.subr.bf16.mxu0 %v2231_v61  ;;  %2242 = vmatprep.subr.bf16.mxu1 %v2231_v61 }
 0x3d9   :  { %2234 = vmatpush3.bf16.msra.mxu0 %v2231_v61  ;;  %2250 = vmatpush3.bf16.msra.mxu1 %v2231_v61 }
 0x3da   :  { %1095 = vperm.xlu1 %2265, %v3006_v7   ;;  %1135 = vperm.xlu0 %2264, %v3008_v12  }
 0x3de   :  { %1100 = vperm.xlu1 %2265, %v3018_v44   ;;  %1140 = vperm.xlu0 %2264, %v3020_v42   ;;  %v994_v42 = vmul.f32 %v2984_v58, %v978_v0 }
 0x3e2   :  { %1105 = vperm.xlu1 %2265, %v3030_v31   ;;  %1145 = vperm.xlu0 %2264, %v3032_v62  }
 0x3e6   :  { %1110 = vperm.xlu1 %2265, %v3036_v40   ;;  %1150 = vperm.xlu0 %2264, %v3038_v46  }
 0x3ea   :  { %1115 = vperm.xlu1 %2265, %v3042_v57   ;;  %1155 = vperm.xlu0 %2264, %v3044_v47   ;;  %v1001_v57 = vmul.f32 %v3050_v29, %v985_v19 }
 0x3ee   :  { %1120 = vperm.xlu1 %2265, %v3048_v37   ;;  %1160 = vperm.xlu0 %2264, %v3050_v29  }
 0x419   :  { %v1003_v13 = vpop.xlane.xlu1 %1002 }
 0x41a   :  { %v1034_v16 = vadd.f32 %v1003_v13, %v986_v9  ;;  %v991_v13 = vmul.f32 %v3036_v40, %v975_v39  ;;  %v998_v40 = vmul.f32 %v3032_v62, %v982_v45 }
 0x41c   :  { %1051 = vst.msk [vmem:[#allocation4] sm:$0xff] %vm289_vm0, %v1034_v16  ;;  %v999_v16 = vmul.f32 %v3038_v46, %v983_v8 }
 0x41d   :  { %v1005_v53 = vpop.xlane.xlu0 %1004 }
 0x41e   :  { %v1035_v15 = vadd.f32 %v1005_v53, %v987_v6 }
 0x420   :  { %1052 = vst.msk [vmem:[#allocation4 + $0x8] sm:$0xff] %vm289_vm0, %v1035_v15 }
 0x421   :  { %v1009_v24 = vpop.xlane.xlu0 %1008 }
 0x422   :  { %v1037_v51 = vadd.f32 %v1009_v24, %v989_v20 }
 0x423   :  { %v1391_v3 = vld [vmem:[#allocation4] sm:$0xff] }
 0x424   :  { %1054 = vst.msk [vmem:[#allocation4 + $0x18] sm:$0xff] %vm289_vm0, %v1037_v51 }
 0x425   :  { %v1007_v18 = vpop.xlane.xlu0 %1006 }
 0x426   :  { %v1036_v22 = vadd.f32 %v1007_v18, %v988_v30  ;;  %v984_v18 = vld [vmem:[#allocation4 + $0x70] sm:$0xff] }
 0x427   :  { %v1392_v54 = vld [vmem:[#allocation4 + $0x8] sm:$0xff]  ;;  %v1000_v37 = vmul.f32 %v3044_v47, %v984_v18 }
 0x428   :  { %1053 = vst.msk [vmem:[#allocation4 + $0x10] sm:$0xff] %vm289_vm0, %v1036_v22  ;;  %2330 = vrcp.f32 %v1392_v54 }
 0x429   :  { %2332 = vrcp.f32 %v1391_v3 }
 0x42b   :  { %v1394_v32 = vld [vmem:[#allocation4 + $0x18] sm:$0xff] }
 0x42c   :  { %v1021_v33 = vpop.xlane.xlu1 %1020  ;;  %2334 = vrcp.f32 %v1394_v32 }
 0x42d   :  { %v1043_v7 = vadd.f32 %v1021_v33, %v995_v27 }
 0x42f   :  { %1060 = vst.msk [vmem:[#allocation4 + $0x48] sm:$0xff] %vm289_vm0, %v1043_v7  ;;  %v1393_v50 = vld [vmem:[#allocation4 + $0x10] sm:$0xff] }
 0x430   :  { %v1025_v21 = vpop.xlane.xlu1 %1024  ;;  %2336 = vrcp.f32 %v1393_v50 }
 0x431   :  { %v1045_v44 = vadd.f32 %v1025_v21, %v997_v38 }
 0x432   :  { %v2331_v59 = vpop.eup %2330 }
 0x433   :  { %1062 = vst.msk [vmem:[#allocation4 + $0x58] sm:$0xff] %vm289_vm0, %v1045_v44  ;;  %1430 = vperm.xlu1 %2265, %v2331_v59   ;;  %v2333_v26 = vpop.eup %2332 }
 0x436   :  { %v1400_v63 = vld [vmem:[#allocation4 + $0x48] sm:$0xff]  ;;  %v2335_v4 = vpop.eup %2334 }
 0x437   :  { %1425 = vperm.xlu1 %2265, %v2333_v26   ;;  %2338 = vrcp.f32 %v1400_v63 }
 0x439   :  { %v1019_v11 = vpop.xlane.xlu0 %1018 }
 0x43a   :  { %v1042_v56 = vadd.f32 %v1019_v11, %v994_v42  ;;  %v2337_v55 = vpop.eup %2336  ;;  %v1402_v46 = vld [vmem:[#allocation4 + $0x58] sm:$0xff] }
 0x43b   :  { %1440 = vperm.xlu1 %2265, %v2335_v4  }
 0x43c   :  { %1059 = vst.msk [vmem:[#allocation4 + $0x40] sm:$0xff] %vm289_vm0, %v1042_v56 }
 0x43d   :  { %v1011_v10 = vpop.xlane.xlu0 %1010 }
 0x43e   :  { %v1023_v9 = vpop.xlane.xlu1 %1022  ;;  %v1038_v14 = vadd.f32 %v1011_v10, %v990_v28 }
 0x43f   :  { %v1044_v58 = vadd.f32 %v1023_v9, %v996_v5  ;;  %1435 = vperm.xlu1 %2265, %v2337_v55  }
 0x440   :  { %1055 = vst.msk [vmem:[#allocation4 + $0x20] sm:$0xff] %vm289_vm0, %v1038_v14 }
 0x441   :  { %v2339_v36 = vpop.eup %2338  ;;  %1061 = vst.msk [vmem:[#allocation4 + $0x50] sm:$0xff] %vm289_vm0, %v1044_v58  ;;  %v1013_v31 = vpop.xlane.xlu0 %1012 }
 0x442   :  { %v1029_v12 = vpop.xlane.xlu1 %1028  ;;  %v1039_v6 = vadd.f32 %v1013_v31, %v991_v13  ;;  %1470 = vperm.xlu0 %2264, %v2339_v36  }
 0x443   :  { %v1047_v52 = vadd.f32 %v1029_v12, %v999_v16  ;;  %v1399_v53 = vld [vmem:[#allocation4 + $0x40] sm:$0xff] }
 0x444   :  { %1056 = vst.msk [vmem:[#allocation4 + $0x28] sm:$0xff] %vm289_vm0, %v1039_v6  ;;  %2340 = vrcp.f32 %v1399_v53 }
 0x445   :  { %1064 = vst.msk [vmem:[#allocation4 + $0x68] sm:$0xff] %vm289_vm0, %v1047_v52  ;;  %v1015_v15 = vpop.xlane.xlu0 %1014  ;;  %2342 = vrcp.f32 %v1402_v46 }
 0x446   :  { %v1027_v20 = vpop.xlane.xlu1 %1026  ;;  %v1040_v43 = vadd.f32 %v1015_v15, %v992_v60 }
 0x447   :  { %v1046_v24 = vadd.f32 %v1027_v20, %v998_v40  ;;  %v1395_v1 = vld [vmem:[#allocation4 + $0x20] sm:$0xff] }
 0x448   :  { %1057 = vst.msk [vmem:[#allocation4 + $0x30] sm:$0xff] %vm289_vm0, %v1040_v43  ;;  %v1401_v51 = vld [vmem:[#allocation4 + $0x50] sm:$0xff] }
 0x449   :  { %1063 = vst.msk [vmem:[#allocation4 + $0x60] sm:$0xff] %vm289_vm0, %v1046_v24  ;;  %v1017_v25 = vpop.xlane.xlu0 %1016  ;;  %2344 = vrcp.f32 %v1401_v51 }
 0x44a   :  { %v1033_v30 = vpop.xlane.xlu1 %1032  ;;  %v1041_v62 = vadd.f32 %v1017_v25, %v993_v49 }
 0x44b   :  { %v1049_v22 = vadd.f32 %v1033_v30, %v1001_v57  ;;  %v1396_v54 = vld [vmem:[#allocation4 + $0x28] sm:$0xff] }
 0x44c   :  { %1058 = vst.msk [vmem:[#allocation4 + $0x38] sm:$0xff] %vm289_vm0, %v1041_v62  ;;  %2346 = vrcp.f32 %v1396_v54  ;;  %v1404_v3 = vld [vmem:[#allocation4 + $0x68] sm:$0xff] }
 0x44d   :  { %1066 = vst.msk [vmem:[#allocation4 + $0x78] sm:$0xff] %vm289_vm0, %v1049_v22  ;;  %2348 = vrcp.f32 %v1395_v1 }
 0x44e   :  { %v2341_v27 = vpop.eup %2340  ;;  %v1031_v33 = vpop.xlane.xlu1 %1030  ;;  %2350 = vrcp.f32 %v1404_v3 }
 0x44f   :  { %v1048_v23 = vadd.f32 %v1031_v33, %v1000_v37  ;;  %1465 = vperm.xlu0 %2264, %v2341_v27   ;;  %v1397_v29 = vld [vmem:[#allocation4 + $0x30] sm:$0xff]  ;;  %v2343_v32 = vpop.eup %2342 }
 0x450   :  { %v1403_v7 = vld [vmem:[#allocation4 + $0x60] sm:$0xff]  ;;  %2352 = vrcp.f32 %v1397_v29 }
 0x451   :  { %1065 = vst.msk [vmem:[#allocation4 + $0x70] sm:$0xff] %vm289_vm0, %v1048_v23  ;;  %2354 = vrcp.f32 %v1403_v7  ;;  %v1086_v12 = vpop.permute.xlu0 %1085 }
 0x452   :  { %v1126_v55 = vpop.permute.xlu1 %1125  ;;  %v1163_v46 = vmul.f32 0.0, %v1086_v12 }
 0x453   :  { %1480 = vperm.xlu0 %2264, %v2343_v32   ;;  %v2345_v38 = vpop.eup %2344  ;;  %v1398_v21 = vld [vmem:[#allocation4 + $0x38] sm:$0xff]  ;;  %v1171_v29 = vmul.f32 0.0, %v1126_v55 }
 0x454   :  { %2356 = vrcp.f32 %v1398_v21  ;;  %v1406_v35 = vld [vmem:[#allocation4 + $0x78] sm:$0xff] }
 0x455   :  { %v1131_v45 = vpop.permute.xlu0 %1130 }
 0x456   :  { %v2347_v44 = vpop.eup %2346  ;;  %v1091_v13 = vpop.permute.xlu1 %1090  ;;  %v1172_v7 = vmul.f32 0.0, %v1131_v45 }
 0x457   :  { %1475 = vperm.xlu0 %2264, %v2345_v38   ;;  %1450 = vperm.xlu1 %2265, %v2347_v44   ;;  %v2349_v50 = vpop.eup %2348  ;;  %v1164_v20 = vmul.f32 0.0, %v1091_v13 }
 0x458   :  { %v1405_v47 = vld [vmem:[#allocation4 + $0x70] sm:$0xff]  ;;  %v2351_v59 = vpop.eup %2350 }
 0x459   :  { %2358 = vrcp.f32 %v1405_v47  ;;  %v1136_v53 = vpop.permute.xlu0 %1135 }
 0x45a   :  { %v2353_v41 = vpop.eup %2352  ;;  %2360 = vrcp.f32 %v1406_v35  ;;  %v1096_v31 = vpop.permute.xlu1 %1095 }
 0x45b   :  { %1490 = vperm.xlu0 %2264, %v2351_v59   ;;  %1445 = vperm.xlu1 %2265, %v2349_v50   ;;  %v2355_v61 = vpop.eup %2354  ;;  %v1165_v62 = vmul.f32 0.0, %v1096_v31  ;;  %v1173_v59 = vmul.f32 0.0, %v1136_v53 }
 0x45d   :  { %v1141_v40 = vpop.permute.xlu0 %1140 }
 0x45e   :  { %v2357_v0 = vpop.eup %2356  ;;  %v1101_v48 = vpop.permute.xlu1 %1100  ;;  %v1174_v35 = vmul.f32 0.0, %v1141_v40 }
 0x45f   :  { %1485 = vperm.xlu0 %2264, %v2355_v61   ;;  %1455 = vperm.xlu1 %2265, %v2353_v41   ;;  %v1166_v18 = vmul.f32 0.0, %v1101_v48 }
 0x461   :  { %v1146_v43 = vpop.permute.xlu0 %1145 }
 0x462   :  { %v1106_v6 = vpop.permute.xlu1 %1105  ;;  %v1175_v13 = vmul.f32 0.0, %v1146_v43 }
 0x463   :  { %v2359_v26 = vpop.eup %2358  ;;  %v1997_v63 = vpop.f32.mrb[32].mxu1  ;;  %1460 = vperm.xlu1 %2265, %v2357_v0  }
 0x464   :  { %1495 = vperm.xlu0 %2264, %v2359_v26   ;;  %v1245_v42 = vpop.f32.mrb[33].mxu1  ;;  %v2361_v11 = vpop.eup %2360  ;;  %v1325_v24 = vadd.f32 %v1997_v63, %v1164_v20  ;;  %v1167_v63 = vmul.f32 0.0, %v1106_v6 }
 0x465   :  { %v1324_v19 = vadd.f32 %v1245_v42, %v1163_v46  ;;  %v1151_v25 = vpop.permute.xlu0 %1150 }
 0x466   :  { %v1111_v52 = vpop.permute.xlu1 %1110  ;;  %v1176_v12 = vmul.f32 0.0, %v1151_v25 }
 0x468   :  { %1500 = vperm.xlu0 %2264, %v2361_v11   ;;  %v1168_v11 = vmul.f32 0.0, %v1111_v52 }
 0x469   :  { %v1156_v3 = vpop.permute.xlu0 %1155 }
 0x46a   :  { %v1116_v60 = vpop.permute.xlu1 %1115 }
 0x46b   :  { %v1169_v31 = vmul.f32 0.0, %v1116_v60 }
 0x46c   :  { %v2000_v34 = vpop.f32.mrb[34].mxu1 }
 0x46d   :  { %v1255_v4 = vpop.f32.mrb[35].mxu1  ;;  %v1327_v54 = vadd.f32 %v2000_v34, %v1166_v18  ;;  %v1161_v33 = vpop.permute.xlu0 %1160 }
 0x46e   :  { %v3102_v15 = vpop.permute.xlu1 %1120  ;;  %v1326_v22 = vadd.f32 %v1255_v4, %v1165_v62 }
 0x474   :  { %v3086_v56 = vpop.f32.mrb[36].mxu1 }
 0x475   :  { %v3088_v2 = vpop.f32.mrb[37].mxu1 }
 0x476   :  { %v1328_v4 = vadd.f32 %v3088_v2, %v1167_v63 }
 0x47c   :  { %v3090_v28 = vpop.f32.mrb[38].mxu1 }
 0x47d   :  { %v3092_v5 = vpop.f32.mrb[39].mxu1 }
 0x480   :  { %v2009_v10 = vpop.f32.mrb[40].mxu1 }
 0x481   :  { %v1285_v39 = vpop.f32.mrb[41].mxu1  ;;  %v1333_v38 = vadd.f32 %v2009_v10, %v1172_v7  ;;  %v1329_v10 = vadd.f32 %v3086_v56, %v1168_v11  ;;  %v1170_v56 = vmul.f32 0.0, %v3102_v15 }
 0x482   :  { %v1332_v32 = vadd.f32 %v1285_v39, %v1171_v29 }
 0x483   :  { %v1331_v60 = vadd.f32 %v3090_v28, %v1170_v56  ;;  %v1722_v28 = vld [vmem:[%s3136_s5] ss:$0 sm:$0xff]  ;;  %s2514_s5 = smov [#allocation15]  }
 0x484   :  { %v2012_v9 = vpop.f32.mrb[42].mxu1  ;;  %s1708_s3 = sshll.u32 %s2514_s5, 4  ;;  %s1709_s3 = int_to_ptr.vmem [resolvable:$true] %s1708_s3 }
 0x485   :  { %v1295_v14 = vpop.f32.mrb[43].mxu1  ;;  %v1335_v61 = vadd.f32 %v2012_v9, %v1174_v35  ;;  %v1330_v9 = vadd.f32 %v3092_v5, %v1169_v31  ;;  %s2472_s24 = scalar_lea.vmem %s1709_s3, 2048  ;;  %p2477_p13 = scmp.lt.s32.totalorder %s1709_s3, %s1709_s3 }
 0x486   :  { %v1334_v41 = vadd.f32 %v1295_v14, %v1173_v59  ;;  %p2473_p12 = scmp.ne.s32.totalorder %s1709_s3, %s2472_s24  ;;  %p2478_p0 = scmp.lt.s32.totalorder %s2472_s24, %s2472_s24 }
 0x488   :  { %v3094_v8 = vpop.f32.mrb[44].mxu1  ;;  %p2479_p1 = por %p2478_p0, %p2477_p13 }
 0x489   :  { %v3096_v58 = vpop.f32.mrb[45].mxu1  ;;  %v1337_v45 = vadd.f32 %v3094_v8, %v1176_v12  ;;  %v1178_v8 = vmul.f32 0.0, %v1161_v33 }
 0x48a   :  { %v1336_v6 = vadd.f32 %v3096_v58, %v1175_v13  ;;  %p2480_p2 = pnand %p2479_p1, %p2473_p12 }
 0x48c   :  { %v3098_v36 = vpop.f32.mrb[46].mxu1 }
 0x48d   :  { %v3100_v16 = vpop.f32.mrb[47].mxu1 }
 0x4b2   :  { %v1431_v17 = vpop.permute.xlu1 %1430 }
 0x4b3   :  { %v1504_v57 = vmul.f32 %v1431_v17, %v1325_v24  ;;  %v1177_v17 = vmul.f32 0.0, %v1156_v3  ;;  %v1339_v24 = vadd.f32 %v3098_v36, %v1178_v8 }
 0x4b5   :  { %v1338_v5 = vadd.f32 %v3100_v16, %v1177_v17 }
 0x4b6   :  { %v1426_v49 = vpop.permute.xlu1 %1425 }
 0x4b7   :  { %v1503_v51 = vmul.f32 %v1426_v49, %v1324_v19 }
 0x4b9   :  { %2051 = vmatprep.mubr.f32.mxu0 %v1503_v51 }
 0x4ba   :  { %v1441_v30 = vpop.permute.xlu1 %1440  ;;  %2052 = vmatmul.mubr.f32.vlgmr.msra.gmra.mrb[32].mxu0 %v1504_v57 }
 0x4bb   :  { %v1506_v27 = vmul.f32 %v1441_v30, %v1327_v54 }
 0x4be   :  { %v1436_v1 = vpop.permute.xlu1 %1435 }
 0x4bf   :  { %v1505_v37 = vmul.f32 %v1436_v1, %v1326_v22 }
 0x4c1   :  { %2054 = vmatprep.mubr.f32.mxu0 %v1505_v37  ;;  %v1471_v23 = vpop.permute.xlu0 %1470 }
 0x4c2   :  { %2055 = vmatmul.mubr.f32.gmra.mrb[34].mxu0 %v1506_v27  ;;  %v1512_v47 = vmul.f32 %v1471_v23, %v1333_v38 }
 0x4ce   :  { %v1466_v21 = vpop.permute.xlu0 %1465 }
 0x4cf   :  { %v1511_v44 = vmul.f32 %v1466_v21, %v1332_v32 }
 0x4d1   :  { %2063 = vmatprep.mubr.f32.mxu1 %v1511_v44 }
 0x4d2   :  { %2064 = vmatmul.mubr.f32.vlgmr.msra.gmra.mrb[48].mxu1 %v1512_v47  ;;  %v1481_v50 = vpop.permute.xlu0 %1480 }
 0x4d3   :  { %v1514_v34 = vmul.f32 %v1481_v50, %v1335_v61 }
 0x4d6   :  { %v1451_v0 = vpop.permute.xlu1 %1450  ;;  %v1476_v26 = vpop.permute.xlu0 %1475 }
 0x4d7   :  { %v1513_v42 = vmul.f32 %v1476_v26, %v1334_v41  ;;  %v1508_v14 = vmul.f32 %v1451_v0, %v1329_v10 }
 0x4d9   :  { %2066 = vmatprep.mubr.f32.mxu1 %v1513_v42 }
 0x4da   :  { %v1446_v39 = vpop.permute.xlu1 %1445  ;;  %2067 = vmatmul.mubr.f32.gmra.mrb[50].mxu1 %v1514_v34  ;;  %v1491_v55 = vpop.permute.xlu0 %1490 }
 0x4db   :  { %v1507_v48 = vmul.f32 %v1446_v39, %v1328_v4  ;;  %v1516_v46 = vmul.f32 %v1491_v55, %v1337_v45 }
 0x4dd   :  { %2057 = vmatprep.mubr.f32.mxu0 %v1507_v48 }
 0x4de   :  { %v1456_v52 = vpop.permute.xlu1 %1455  ;;  %2058 = vmatmul.mubr.f32.gmra.mrb[36].mxu0 %v1508_v14  ;;  %v1486_v2 = vpop.permute.xlu0 %1485 }
 0x4df   :  { %v1509_v53 = vmul.f32 %v1456_v52, %v1330_v9  ;;  %v1515_v40 = vmul.f32 %v1486_v2, %v1336_v6 }
 0x4e1   :  { %2060 = vmatprep.mubr.f32.mxu0 %v1509_v53  ;;  %2069 = vmatprep.mubr.f32.mxu1 %v1515_v40 }
 0x4e2   :  { %v1461_v20 = vpop.permute.xlu1 %1460  ;;  %2070 = vmatmul.mubr.f32.gmra.mrb[52].mxu1 %v1516_v46 }
 0x4e3   :  { %v1510_v58 = vmul.f32 %v1461_v20, %v1331_v60  ;;  %v1496_v43 = vpop.permute.xlu0 %1495 }
 0x4e4   :  { %v1517_v19 = vmul.f32 %v1496_v43, %v1338_v5 }
 0x4e5   :  { %2061 = vmatmul.mubr.f32.gmra.mrb[38].mxu0 %v1510_v58 }
 0x4e6   :  { %2072 = vmatprep.mubr.f32.mxu1 %v1517_v19 }
 0x4e7   :  { %v1501_v15 = vpop.permute.xlu0 %1500 }
 0x4e8   :  { %v1518_v49 = vmul.f32 %v1501_v15, %v1339_v24 }
 0x4ea   :  { %2073 = vmatmul.mubr.f32.gmra.mrb[54].mxu1 %v1518_v49 }
 0x58d   :  { %v2053_v51 = vpop.f32.mrb[32].mxu0 }
 0x58e   :  { %v1614_v57 = vadd.f32 %v2053_v51, %v1722_v28  ;;  %v1608_v16 = vpop.f32.mrb[33].mxu0 }
 0x58f   :  { %v1609_v25 = vadd.f32 %v1722_v28, %v1608_v16 }
 0x590   :  { %1688 = vst [vmem:[#allocation15 + $0x8] sm:$0xff] %v1614_v57 }
 0x591   :  { %1687 = vst [vmem:[#allocation15] sm:$0xff] %v1609_v25 }
 0x595   :  { %v2056_v30 = vpop.f32.mrb[34].mxu0 }
 0x596   :  { %v1624_v62 = vadd.f32 %v2056_v30, %v1722_v28  ;;  %v1618_v18 = vpop.f32.mrb[35].mxu0 }
 0x597   :  { %v1619_v22 = vadd.f32 %v1722_v28, %v1618_v18 }
 0x598   :  { %1690 = vst [vmem:[#allocation15 + $0x18] sm:$0xff] %v1624_v62 }
 0x599   :  { %1689 = vst [vmem:[#allocation15 + $0x10] sm:$0xff] %v1619_v22 }
 0x5a5   :  { %v2065_v36 = vpop.f32.mrb[48].mxu1 }
 0x5a6   :  { %v1654_v54 = vadd.f32 %v2065_v36, %v1722_v28  ;;  %v1648_v1 = vpop.f32.mrb[49].mxu1 }
 0x5a7   :  { %v1649_v37 = vadd.f32 %v1722_v28, %v1648_v1 }
 0x5a8   :  { %1696 = vst [vmem:[#allocation15 + $0x48] sm:$0xff] %v1654_v54 }
 0x5a9   :  { %1695 = vst [vmem:[#allocation15 + $0x40] sm:$0xff] %v1649_v37 }
 0x5ad   :  { %v2068_v3 = vpop.f32.mrb[50].mxu1 }
 0x5ae   :  { %v1664_v27 = vadd.f32 %v2068_v3, %v1722_v28  ;;  %v1658_v33 = vpop.f32.mrb[51].mxu1 }
 0x5af   :  { %v1659_v23 = vadd.f32 %v1722_v28, %v1658_v33 }
 0x5b0   :  { %1698 = vst [vmem:[#allocation15 + $0x58] sm:$0xff] %v1664_v27 }
 0x5b1   :  { %1697 = vst [vmem:[#allocation15 + $0x50] sm:$0xff] %v1659_v23  ;;  %v2059_v29 = vpop.f32.mrb[36].mxu0 }
 0x5b2   :  { %v1634_v7 = vadd.f32 %v2059_v29, %v1722_v28  ;;  %v1628_v32 = vpop.f32.mrb[37].mxu0 }
 0x5b3   :  { %v1629_v38 = vadd.f32 %v1722_v28, %v1628_v32 }
 0x5b4   :  { %1692 = vst [vmem:[#allocation15 + $0x28] sm:$0xff] %v1634_v7 }
 0x5b5   :  { %1691 = vst [vmem:[#allocation15 + $0x20] sm:$0xff] %v1629_v38  ;;  %v2071_v21 = vpop.f32.mrb[52].mxu1 }
 0x5b6   :  { %v1674_v44 = vadd.f32 %v2071_v21, %v1722_v28  ;;  %v1668_v47 = vpop.f32.mrb[53].mxu1 }
 0x5b7   :  { %v1669_v50 = vadd.f32 %v1722_v28, %v1668_v47 }
 0x5b8   :  { %1700 = vst [vmem:[#allocation15 + $0x68] sm:$0xff] %v1674_v44  ;;  %v2062_v59 = vpop.f32.mrb[38].mxu0 }
 0x5b9   :  { %1699 = vst [vmem:[#allocation15 + $0x60] sm:$0xff] %v1669_v50  ;;  %v1644_v35 = vadd.f32 %v2062_v59, %v1722_v28  ;;  %v1638_v41 = vpop.f32.mrb[39].mxu0 }
 0x5ba   :  { %v1639_v61 = vadd.f32 %v1722_v28, %v1638_v41 }
 0x5bb   :  { %1694 = vst [vmem:[#allocation15 + $0x38] sm:$0xff] %v1644_v35 }
 0x5bc   :  { %1693 = vst [vmem:[#allocation15 + $0x30] sm:$0xff] %v1639_v61 }
 0x5bd   :  { %v2074_v0 = vpop.f32.mrb[54].mxu1 }
 0x5be   :  { %v1684_v26 = vadd.f32 %v2074_v0, %v1722_v28  ;;  %v1678_v63 = vpop.f32.mrb[55].mxu1 }
 0x5bf   :  { %v1679_v42 = vadd.f32 %v1722_v28, %v1678_v63 }
 0x5c0   :  { %1702 = vst [vmem:[#allocation15 + $0x78] sm:$0xff] %v1684_v26 }
 0x5c1   :  { %1701 = vst [vmem:[#allocation15 + $0x70] sm:$0xff] %v1679_v42 }
 0x5c2   :  { %2483 = shalt.err (!%p2480_p2)
}
 0x5c3   :  { %s2484_s16 = scalar_lea.hbm %s3137_s6, 2048 }
 0x5c4   :  { %p2485_p3 = scmp.ne.s32.totalorder %s3137_s6, %s2484_s16  ;;  %p2488_p4 = scmp.lt.u32.totalorder %s2484_s16, %s3137_s6 }
 0x5c6   :  { %p2490_p5 = pnand %p2488_p4, %p2485_p3 }
 0x5c8   :  { %2493 = shalt.err (!%p2490_p5)
}
 0x5c9   :  { %1714 = dma.vmem_to_hbm [thread:$0]  %s1709_s3, 2048, %s3137_s6, [#allocation8], %s2504_s9, %s2504_s9, %s2505_s10  }
 0x5ca   :  { %2500 = dma.done.wait [#allocation8], 2048  }
 0x5cb   :  { %2501 = vsyncadd [#allocation8], 4294965248 }
 0x5cc   :  { %1718 = vsyncpa [#allocation7], 1 }
 0x5cd   :  { %1719 = vsyncpa [#allocation10], 1 }
 0x5ce   :  { %1720 = vsyncpa [#allocation13], 1 }
 0x5cf   :  { %1721 = vsyncpa [#allocation8], 1 }

</bundles_post_ra>
